<compile_context>
chip_gen: v6e
topology: v6e:2x2x1
jax: 0.10.0
libtpu: 0.0.40
codegen_flags: <defaults>
</compile_context>

<pallas_src>
import jax
import jax.numpy as jnp
from jax.experimental import pallas as pl
from jax.experimental.pallas import tpu as pltpu

EPS = 1e-5        # nn.LayerNorm default eps
NEG_INF = -1e30   # finite additive mask (avoids NaN hazard of -inf)
LANE = 128


def _layernorm(x, w, b):
    mu = jnp.mean(x, axis=-1, keepdims=True)
    var = jnp.mean((x - mu) ** 2, axis=-1, keepdims=True)
    return (x - mu) * jax.lax.rsqrt(var + EPS) * w + b


# ---------------------------------------------------------------------------
# Body kernel: one TransformerBlock (MHA, MHA, FFN) per grid step.
# ---------------------------------------------------------------------------
def transformer_block_kernel(x_ref, wq_ref, wk_ref, wv_ref, wp_ref, ap_ref,
                             w1_ref, b1_ref, w2_ref, fp_ref, act_ref):
    @pl.when(pl.program_id(0) == 0)
    def _():
        act_ref[...] = x_ref[...]          # seed the carried activation

    x = act_ref[...]                       # (T, E) f32, VMEM-resident
    T = x.shape[0]
    H = wq_ref.shape[1]

    # additive causal mask built in-kernel (two iota compares, no HBM input)
    row = jax.lax.broadcasted_iota(jnp.int32, (T, T), 0)
    col = jax.lax.broadcasted_iota(jnp.int32, (T, T), 1)
    addmask = jnp.where(row >= col, 0.0, NEG_INF).astype(jnp.float32)

    def attention(x, li):
        xb = x.astype(jnp.bfloat16)
        xh = jnp.broadcast_to(xb[None], (H,) + xb.shape)        # (H, T, E)
        q = jnp.einsum('hte,hef->htf', xh, wq_ref[li],
                       preferred_element_type=jnp.float32)      # (H, T, hd)
        k = jnp.einsum('hte,hef->htf', xh, wk_ref[li],
                       preferred_element_type=jnp.float32)
        v = jnp.einsum('hte,hef->htf', xh, wv_ref[li],
                       preferred_element_type=jnp.float32)
        s = jnp.einsum('htf,hsf->hts', q.astype(jnp.bfloat16),
                       k.astype(jnp.bfloat16),
                       preferred_element_type=jnp.float32)      # (H, T, T)
        s = s + addmask[None]
        m = jnp.max(s, axis=-1, keepdims=True)
        e = jnp.exp(s - m)
        p = e * pl.reciprocal(jnp.sum(e, axis=-1, keepdims=True), approx=True)
        vals = jnp.einsum('hts,hsf->htf', p.astype(jnp.bfloat16),
                          v.astype(jnp.bfloat16),
                          preferred_element_type=jnp.float32)   # (H, T, hd)
        # torch.cat-prepend head order is folded into wp rows at pack time;
        # contract heads with a batched matmul + leading-axis reduce
        # (no lane-dim concat, no misaligned lane slices).
        proj = jnp.einsum('htf,hfe->hte', vals.astype(jnp.bfloat16), wp_ref[li],
                          preferred_element_type=jnp.float32).sum(axis=0)
        ap = ap_ref[li]                    # (3, E): [bias, ln_w, ln_b]
        out = proj + ap[0:1] + x
        return _layernorm(out, ap[1:2], ap[2:3])

    def ffn(x):
        xb = x.astype(jnp.bfloat16)
        h = jnp.dot(xb, w1_ref[0], preferred_element_type=jnp.float32) + b1_ref[0]
        h = jnp.maximum(h, 0.0)
        y = (jnp.dot(h.astype(jnp.bfloat16), w2_ref[0],
                     preferred_element_type=jnp.float32)
             + fp_ref[0][0:1] + x)
        return _layernorm(y, fp_ref[0][1:2], fp_ref[0][2:3])

    x = attention(x, 0)                    # MHA #1 of this block
    x = attention(x, 1)                    # MHA #2 of this block
    x = ffn(x)
    act_ref[...] = x


# ---------------------------------------------------------------------------
# Output head kernel: lane-dense, vocab-tiled, "parallel" grid axis.
# ---------------------------------------------------------------------------
def lm_head_kernel(x_ref, ow_ref, ob_ref, o_ref):
    o_ref[...] = (jnp.dot(x_ref[...].astype(jnp.bfloat16), ow_ref[...],
                          preferred_element_type=jnp.float32)
                  + ob_ref[...])


# ---------------------------------------------------------------------------
# Pack torch-layout params into stacked, kernel-friendly (bf16) arrays.
# ---------------------------------------------------------------------------
def _pack_kernel_params(params):
    blocks = params['blocks']
    H, E, hd = blocks[0]['mha1']['wq'].shape
    attn = [b[name] for b in blocks for name in ('mha1', 'mha2')]
    ffn = [b['ffn'] for b in blocks]

    def fold_wp(wp):
        # torch.cat prepends each new head's values, so natural head h must
        # read projection rows [(H-1-h)*hd : (H-h)*hd].
        return wp.reshape(H, hd, E)[::-1]

    wq = jnp.stack([p['wq'] for p in attn]).astype(jnp.bfloat16)   # (L,H,E,hd)
    wk = jnp.stack([p['wk'] for p in attn]).astype(jnp.bfloat16)
    wv = jnp.stack([p['wv'] for p in attn]).astype(jnp.bfloat16)
    wp = jnp.stack([fold_wp(p['wp']) for p in attn]).astype(jnp.bfloat16)
    ap = jnp.stack([jnp.concatenate([p['bp'], p['lnw'], p['lnb']], axis=0)
                    for p in attn]).astype(jnp.float32)            # (L,3,E)

    w1 = jnp.stack([p['w1'] for p in ffn]).astype(jnp.bfloat16)    # (NB,E,8E)
    b1 = jnp.stack([p['b1'] for p in ffn]).astype(jnp.float32)     # (NB,1,8E)
    w2 = jnp.stack([p['w2'] for p in ffn]).astype(jnp.bfloat16)    # (NB,8E,E)
    fp = jnp.stack([jnp.concatenate([p['b2'], p['lnw'], p['lnb']], axis=0)
                    for p in ffn]).astype(jnp.float32)             # (NB,3,E)

    V = params['out_w'].shape[1]
    Vp = -(-V // LANE) * LANE
    out_w = jnp.pad(params['out_w'], ((0, 0), (0, Vp - V))).astype(jnp.bfloat16)
    out_b = jnp.pad(params['out_b'], ((0, 0), (0, Vp - V))).astype(jnp.float32)
    return dict(wq=wq, wk=wk, wv=wv, wp=wp, ap=ap,
                w1=w1, b1=b1, w2=w2, fp=fp, out_w=out_w, out_b=out_b)


# ---------------------------------------------------------------------------
# Full forward: embeddings (glue) + layer-gridded body + vocab-tiled head.
# ---------------------------------------------------------------------------
def transformer_forward(params, tokens):
    T = tokens.shape[0]
    E = params['tok_emb'].shape[1]
    V = params['out_w'].shape[1]
    NB = len(params['blocks'])
    H = params['blocks'][0]['mha1']['wq'].shape[0]
    hd = E // H
    hidden = params['blocks'][0]['ffn']['w1'].shape[1]

    x = (params['tok_emb'][tokens]
         + params['pos_emb'][jnp.arange(T)]).astype(jnp.float32)

    packed = _pack_kernel_params(params)
    Vp = packed['out_w'].shape[1]

    # --- transformer body: grid over blocks, per-block weight streaming ---
    acts = pl.pallas_call(
        transformer_block_kernel,
        out_shape=jax.ShapeDtypeStruct((T, E), jnp.float32),
        grid=(NB,),
        in_specs=[
            pl.BlockSpec((T, E), lambda b: (0, 0)),                 # x (seed)
            pl.BlockSpec((2, H, E, hd), lambda b: (b, 0, 0, 0)),    # wq
            pl.BlockSpec((2, H, E, hd), lambda b: (b, 0, 0, 0)),    # wk
            pl.BlockSpec((2, H, E, hd), lambda b: (b, 0, 0, 0)),    # wv
            pl.BlockSpec((2, H, hd, E), lambda b: (b, 0, 0, 0)),    # wp (folded)
            pl.BlockSpec((2, 3, E), lambda b: (b, 0, 0)),           # bp/lnw/lnb
            pl.BlockSpec((1, E, hidden), lambda b: (b, 0, 0)),      # w1
            pl.BlockSpec((1, 1, hidden), lambda b: (b, 0, 0)),      # b1
            pl.BlockSpec((1, hidden, E), lambda b: (b, 0, 0)),      # w2
            pl.BlockSpec((1, 3, E), lambda b: (b, 0, 0)),           # b2/lnw/lnb
        ],
        out_specs=pl.BlockSpec((T, E), lambda b: (0, 0)),           # carried act
        compiler_params=pltpu.CompilerParams(
            dimension_semantics=("arbitrary",)),
    )(x, packed['wq'], packed['wk'], packed['wv'], packed['wp'], packed['ap'],
      packed['w1'], packed['b1'], packed['w2'], packed['fp'])

    # --- output head: vocab-tiled, parallel grid axis, lane-dense stores ---
    VTILE = Vp
    for cand in (512, 256, 128):
        if Vp % cand == 0:
            VTILE = cand
            break

    logits_padded = pl.pallas_call(
        lm_head_kernel,
        out_shape=jax.ShapeDtypeStruct((T, Vp), jnp.float32),
        grid=(Vp // VTILE,),
        in_specs=[
            pl.BlockSpec((T, E), lambda j: (0, 0)),
            pl.BlockSpec((E, VTILE), lambda j: (0, j)),
            pl.BlockSpec((1, VTILE), lambda j: (0, j)),
        ],
        out_specs=pl.BlockSpec((T, VTILE), lambda j: (0, j)),
        compiler_params=pltpu.CompilerParams(
            dimension_semantics=("parallel",)),
    )(acts, packed['out_w'], packed['out_b'])
    return logits_padded[:, :V]


# ---------------------------------------------------------------------------
# Parameter init (deterministic, shapes from the PyTorch __init__)
# ---------------------------------------------------------------------------
def init_params(key, emb_size, num_blocks, num_heads, context_size, vocab_size):
    head_size = emb_size // num_heads
    hidden = emb_size * 8
    keys = jax.random.split(key, 4 + num_blocks)

    def w(k, shape, scale=0.1):
        return jax.random.normal(k, shape, jnp.float32) * scale

    params = {
        'tok_emb': w(keys[0], (vocab_size, emb_size), 0.5),
        'pos_emb': w(keys[1], (context_size, emb_size), 0.5),
        'out_w': w(keys[2], (emb_size, vocab_size)),
        'out_b': w(keys[3], (1, vocab_size)),
        'blocks': [],
    }

    def mha_params(ks):
        return {
            'wq': w(ks[0], (num_heads, emb_size, head_size)),
            'wk': w(ks[1], (num_heads, emb_size, head_size)),
            'wv': w(ks[2], (num_heads, emb_size, head_size)),
            'wp': w(ks[3], (emb_size, emb_size)),
            'bp': w(ks[4], (1, emb_size)),
            'lnw': jnp.ones((1, emb_size), jnp.float32),
            'lnb': jnp.zeros((1, emb_size), jnp.float32),
        }

    for bi in range(num_blocks):
        bkeys = jax.random.split(keys[4 + bi], 14)
        block = {
            'mha1': mha_params(bkeys[0:5]),
            'mha2': mha_params(bkeys[5:10]),
            'ffn': {
                'w1': w(bkeys[10], (emb_size, hidden)),
                'b1': w(bkeys[11], (1, hidden)),
                'w2': w(bkeys[12], (hidden, emb_size)),
                'b2': w(bkeys[13], (1, emb_size)),
                'lnw': jnp.ones((1, emb_size), jnp.float32),
                'lnb': jnp.zeros((1, emb_size), jnp.float32),
            },
        }
        params['blocks'].append(block)
    return params


# ---------------------------------------------------------------------------
# Pure-JAX reference, faithful to the PyTorch module semantics
# ---------------------------------------------------------------------------
def reference_forward(params, tokens, mask):
    def ln(x, w, b):
        mu = x.mean(-1, keepdims=True)
        var = ((x - mu) ** 2).mean(-1, keepdims=True)
        return (x - mu) / jnp.sqrt(var + EPS) * w + b

    def mha(x, p):
        H = p['wq'].shape[0]
        vals = []
        for h in range(H):
            q, k, v = x @ p['wq'][h], x @ p['wk'][h], x @ p['wv'][h]
            a = q @ k.T
            a = jnp.where(mask == 0, -jnp.inf, a)
            a = jax.nn.softmax(a, axis=-1)
            vals.append(a @ v)
        values = jnp.concatenate(vals[::-1], axis=-1)      # torch.cat prepends
        out = values @ p['wp'] + p['bp'] + x
        return ln(out, p['lnw'], p['lnb'])

    def ffn(x, p):
        h = jnp.maximum(x @ p['w1'] + p['b1'], 0.0)
        return ln(h @ p['w2'] + p['b2'] + x, p['lnw'], p['lnb'])

    x = params['tok_emb'][tokens] + params['pos_emb'][jnp.arange(tokens.shape[0])]
    for b in params['blocks']:
        x = mha(x, b['mha1'])
        x = mha(x, b['mha2'])
        x = ffn(x, b['ffn'])
    return x @ params['out_w'] + params['out_b']


if __name__ == "__main__":
    emb_size, num_blocks, num_heads, context_size, vocab_size = 32, 2, 4, 8, 64

    key = jax.random.PRNGKey(0)
    pkey, tkey = jax.random.split(key)
    params = init_params(pkey, emb_size, num_blocks, num_heads,
                         context_size, vocab_size)
    tokens = jax.random.randint(tkey, (context_size,), 0, vocab_size,
                                dtype=jnp.int32)

    logits = jax.block_until_ready(transformer_forward(params, tokens))

    mask = jnp.tril(jnp.ones((context_size, context_size), jnp.float32))
    with jax.default_matmul_precision('highest'):
        ref = jax.block_until_ready(reference_forward(params, tokens, mask))

    assert logits.shape == (context_size, vocab_size)
    assert bool(jnp.all(jnp.isfinite(logits)))
    # bf16 matmul operands (f32 accumulate) vs. an all-f32 reference
    max_err = float(jnp.max(jnp.abs(logits - ref)))
    assert bool(jnp.allclose(logits, ref, atol=5e-2, rtol=5e-2)), max_err
    print("KERNEL_OK")
</pallas_src>

<mosaic_0001>
module attributes {stable_mosaic.version = 11 : i64} {
  func.func @transformer_block_kernel(%arg0: i32, %arg1: memref<8x32xf32, #tpu.memory_space<vmem>>, %arg2: memref<2x4x32x8xbf16, #tpu.memory_space<vmem>>, %arg3: memref<2x4x32x8xbf16, #tpu.memory_space<vmem>>, %arg4: memref<2x4x32x8xbf16, #tpu.memory_space<vmem>>, %arg5: memref<2x4x8x32xbf16, #tpu.memory_space<vmem>>, %arg6: memref<2x3x32xf32, #tpu.memory_space<vmem>>, %arg7: memref<1x32x256xbf16, #tpu.memory_space<vmem>>, %arg8: memref<1x1x256xf32, #tpu.memory_space<vmem>>, %arg9: memref<1x256x32xbf16, #tpu.memory_space<vmem>>, %arg10: memref<1x3x32xf32, #tpu.memory_space<vmem>>, %arg11: memref<8x32xf32, #tpu.memory_space<vmem>>) attributes {dimension_semantics = [#tpu.dimension_semantics<arbitrary>], iteration_bounds = array<i64: 2>, scalar_prefetch = 0 : i64, scratch_operands = 0 : i64, tpu.core_type = #tpu.core_type<tc>, window_params = [{pipeline_mode = #tpu.pipeline_mode<synchronous>, transform_indices = @transform_0, window_bounds = array<i64: 8, 32>}, {transform_indices = @transform_1, window_bounds = array<i64: 2, 4, 32, 8>}, {transform_indices = @transform_2, window_bounds = array<i64: 2, 4, 32, 8>}, {transform_indices = @transform_3, window_bounds = array<i64: 2, 4, 32, 8>}, {transform_indices = @transform_4, window_bounds = array<i64: 2, 4, 8, 32>}, {transform_indices = @transform_5, window_bounds = array<i64: 2, 3, 32>}, {transform_indices = @transform_6, window_bounds = array<i64: 1, 32, 256>}, {transform_indices = @transform_7, window_bounds = array<i64: 1, 1, 256>}, {transform_indices = @transform_8, window_bounds = array<i64: 1, 256, 32>}, {transform_indices = @transform_9, window_bounds = array<i64: 1, 3, 32>}, {pipeline_mode = #tpu.pipeline_mode<synchronous>, transform_indices = @transform_10, window_bounds = array<i64: 8, 32>}]} {
    %c0_i32 = arith.constant 0 : i32
    %0 = arith.cmpi eq, %arg0, %c0_i32 : i32
    %1 = arith.extui %0 : i1 to i32
    %c0_i32_0 = arith.constant 0 : i32
    %2 = arith.cmpi ne, %1, %c0_i32_0 : i32
    scf.if %2 {
      %c0_96 = arith.constant 0 : index
      %c0_97 = arith.constant 0 : index
      %193 = vector.load %arg1[%c0_96, %c0_97] : memref<8x32xf32, #tpu.memory_space<vmem>>, vector<8x32xf32>
      %c0_98 = arith.constant 0 : index
      %c0_99 = arith.constant 0 : index
      %194 = vector.load %arg11[%c0_98, %c0_99] : memref<8x32xf32, #tpu.memory_space<vmem>>, vector<8x32xf32>
      tpu.vector_store %arg11[%c0_98, %c0_99], %193 {strides = array<i32>} : memref<8x32xf32, #tpu.memory_space<vmem>>, vector<8x32xf32>,
    } else {
    }
    %c0 = arith.constant 0 : index
    %c0_1 = arith.constant 0 : index
    %3 = vector.load %arg11[%c0, %c0_1] : memref<8x32xf32, #tpu.memory_space<vmem>>, vector<8x32xf32>
    %4 = tpu.iota {dimensions = array<i32: 0>} : vector<8x8xi32>
    %5 = tpu.iota {dimensions = array<i32: 1>} : vector<8x8xi32>
    %6 = arith.cmpi sge, %4, %5 : vector<8x8xi32>
    %cst = arith.constant 0.000000e+00 : f32
    %cst_2 = arith.constant -1.000000e+30 : f32
    %7 = vector.broadcast %cst : f32 to vector<8x8xf32>
    %8 = vector.broadcast %cst_2 : f32 to vector<8x8xf32>
    %9 = arith.select %6, %7, %8 : vector<8x8xi1>, vector<8x8xf32>
    %10 = arith.truncf %3 : vector<8x32xf32> to vector<8x32xbf16>
    %11 = vector.shape_cast %10 : vector<8x32xbf16> to vector<1x8x32xbf16>
    %12 = vector.shape_cast %11 : vector<1x8x32xbf16> to vector<1x8x32xbf16>
    %13 = vector.broadcast %12 : vector<1x8x32xbf16> to vector<4x8x32xbf16>
    %c0_3 = arith.constant 0 : index
    %c0_4 = arith.constant 0 : index
    %c0_5 = arith.constant 0 : index
    %c0_6 = arith.constant 0 : index
    %14 = vector.load %arg2[%c0_3, %c0_4, %c0_5, %c0_6] : memref<2x4x32x8xbf16, #tpu.memory_space<vmem>>, vector<1x4x32x8xbf16>
    %15 = vector.shape_cast %14 : vector<1x4x32x8xbf16> to vector<4x32x8xbf16>
    "tpu.trace_start"() <{level = 10 : i32, message = "hte,hef->htf"}> : () -> ()
    %cst_7 = arith.constant dense<0.000000e+00> : vector<4x8x8xf32>
    %16 = tpu.matmul %13, %15, %cst_7 {dimension_numbers = #tpu.dot_dimension_numbers<[2], [1], [1], [2], [0, 0, 0, 1, 1, 2], [0], [0]>} : vector<4x8x32xbf16>, vector<4x32x8xbf16>, vector<4x8x8xf32> -> vector<4x8x8xf32>
    "tpu.trace_stop"() : () -> ()
    %c0_8 = arith.constant 0 : index
    %c0_9 = arith.constant 0 : index
    %c0_10 = arith.constant 0 : index
    %c0_11 = arith.constant 0 : index
    %17 = vector.load %arg3[%c0_8, %c0_9, %c0_10, %c0_11] : memref<2x4x32x8xbf16, #tpu.memory_space<vmem>>, vector<1x4x32x8xbf16>
    %18 = vector.shape_cast %17 : vector<1x4x32x8xbf16> to vector<4x32x8xbf16>
    "tpu.trace_start"() <{level = 10 : i32, message = "hte,hef->htf"}> : () -> ()
    %cst_12 = arith.constant dense<0.000000e+00> : vector<4x8x8xf32>
    %19 = tpu.matmul %13, %18, %cst_12 {dimension_numbers = #tpu.dot_dimension_numbers<[2], [1], [1], [2], [0, 0, 0, 1, 1, 2], [0], [0]>} : vector<4x8x32xbf16>, vector<4x32x8xbf16>, vector<4x8x8xf32> -> vector<4x8x8xf32>
    "tpu.trace_stop"() : () -> ()
    %c0_13 = arith.constant 0 : index
    %c0_14 = arith.constant 0 : index
    %c0_15 = arith.constant 0 : index
    %c0_16 = arith.constant 0 : index
    %20 = vector.load %arg4[%c0_13, %c0_14, %c0_15, %c0_16] : memref<2x4x32x8xbf16, #tpu.memory_space<vmem>>, vector<1x4x32x8xbf16>
    %21 = vector.shape_cast %20 : vector<1x4x32x8xbf16> to vector<4x32x8xbf16>
    "tpu.trace_start"() <{level = 10 : i32, message = "hte,hef->htf"}> : () -> ()
    %cst_17 = arith.constant dense<0.000000e+00> : vector<4x8x8xf32>
    %22 = tpu.matmul %13, %21, %cst_17 {dimension_numbers = #tpu.dot_dimension_numbers<[2], [1], [1], [2], [0, 0, 0, 1, 1, 2], [0], [0]>} : vector<4x8x32xbf16>, vector<4x32x8xbf16>, vector<4x8x8xf32> -> vector<4x8x8xf32>
    "tpu.trace_stop"() : () -> ()
    %23 = arith.truncf %16 : vector<4x8x8xf32> to vector<4x8x8xbf16>
    %24 = arith.truncf %19 : vector<4x8x8xf32> to vector<4x8x8xbf16>
    "tpu.trace_start"() <{level = 10 : i32, message = "htf,hsf->hts"}> : () -> ()
    %cst_18 = arith.constant dense<0.000000e+00> : vector<4x8x8xf32>
    %25 = tpu.matmul %23, %24, %cst_18 {dimension_numbers = #tpu.dot_dimension_numbers<[2], [2], [1], [1], [0, 0, 0, 1, 1, 1], [0], [0]>} : vector<4x8x8xbf16>, vector<4x8x8xbf16>, vector<4x8x8xf32> -> vector<4x8x8xf32>
    "tpu.trace_stop"() : () -> ()
    %26 = vector.shape_cast %9 : vector<8x8xf32> to vector<1x8x8xf32>
    %27 = vector.broadcast %26 : vector<1x8x8xf32> to vector<4x8x8xf32>
    %28 = arith.addf %25, %27 : vector<4x8x8xf32>
    %cst_19 = arith.constant dense<0xFF800000> : vector<4x8xf32>
    %29 = vector.multi_reduction <maximumf>, %28, %cst_19 [2] : vector<4x8x8xf32> to vector<4x8xf32>
    %30 = vector.shape_cast %29 : vector<4x8xf32> to vector<4x8x1xf32>
    %31 = vector.broadcast %30 : vector<4x8x1xf32> to vector<4x8x8xf32>
    %32 = arith.subf %28, %31 : vector<4x8x8xf32>
    %33 = math.exp %32 : vector<4x8x8xf32>
    %cst_20 = arith.constant dense<0.000000e+00> : vector<4x8xf32>
    %34 = vector.multi_reduction <add>, %33, %cst_20 [2] : vector<4x8x8xf32> to vector<4x8xf32>
    %35 = vector.shape_cast %34 : vector<4x8xf32> to vector<4x8x1xf32>
    %36 = tpu.reciprocal %35 {approx = true} : vector<4x8x1xf32> -> vector<4x8x1xf32>
    %37 = vector.broadcast %36 : vector<4x8x1xf32> to vector<4x8x8xf32>
    %38 = arith.mulf %33, %37 : vector<4x8x8xf32>
    %39 = arith.truncf %38 : vector<4x8x8xf32> to vector<4x8x8xbf16>
    %40 = arith.truncf %22 : vector<4x8x8xf32> to vector<4x8x8xbf16>
    "tpu.trace_start"() <{level = 10 : i32, message = "hts,hsf->htf"}> : () -> ()
    %cst_21 = arith.constant dense<0.000000e+00> : vector<4x8x8xf32>
    %41 = tpu.matmul %39, %40, %cst_21 {dimension_numbers = #tpu.dot_dimension_numbers<[2], [1], [1], [2], [0, 0, 0, 1, 1, 2], [0], [0]>} : vector<4x8x8xbf16>, vector<4x8x8xbf16>, vector<4x8x8xf32> -> vector<4x8x8xf32>
    "tpu.trace_stop"() : () -> ()
    %42 = arith.truncf %41 : vector<4x8x8xf32> to vector<4x8x8xbf16>
    %c0_22 = arith.constant 0 : index
    %c0_23 = arith.constant 0 : index
    %c0_24 = arith.constant 0 : index
    %c0_25 = arith.constant 0 : index
    %43 = vector.load %arg5[%c0_22, %c0_23, %c0_24, %c0_25] : memref<2x4x8x32xbf16, #tpu.memory_space<vmem>>, vector<1x4x8x32xbf16>
    %44 = vector.shape_cast %43 : vector<1x4x8x32xbf16> to vector<4x8x32xbf16>
    "tpu.trace_start"() <{level = 10 : i32, message = "htf,hfe->hte"}> : () -> ()
    %cst_26 = arith.constant dense<0.000000e+00> : vector<4x8x32xf32>
    %45 = tpu.matmul %42, %44, %cst_26 {dimension_numbers = #tpu.dot_dimension_numbers<[2], [1], [1], [2], [0, 0, 0, 1, 1, 2], [0], [0]>} : vector<4x8x8xbf16>, vector<4x8x32xbf16>, vector<4x8x32xf32> -> vector<4x8x32xf32>
    "tpu.trace_stop"() : () -> ()
    %cst_27 = arith.constant dense<0.000000e+00> : vector<8x32xf32>
    %46 = vector.multi_reduction <add>, %45, %cst_27 [0] : vector<4x8x32xf32> to vector<8x32xf32>
    %c0_28 = arith.constant 0 : index
    %c0_29 = arith.constant 0 : index
    %c0_30 = arith.constant 0 : index
    %47 = vector.load %arg6[%c0_28, %c0_29, %c0_30] : memref<2x3x32xf32, #tpu.memory_space<vmem>>, vector<1x3x32xf32>
    %48 = vector.shape_cast %47 : vector<1x3x32xf32> to vector<3x32xf32>
    %49 = vector.extract_strided_slice %48 {offsets = [0, 0], sizes = [1, 32], strides = [1, 1]} : vector<3x32xf32> to vector<1x32xf32>
    %50 = vector.broadcast %49 : vector<1x32xf32> to vector<8x32xf32>
    %51 = arith.addf %46, %50 : vector<8x32xf32>
    %52 = arith.addf %51, %3 : vector<8x32xf32>
    %53 = vector.extract_strided_slice %48 {offsets = [1, 0], sizes = [1, 32], strides = [1, 1]} : vector<3x32xf32> to vector<1x32xf32>
    %54 = vector.extract_strided_slice %48 {offsets = [2, 0], sizes = [1, 32], strides = [1, 1]} : vector<3x32xf32> to vector<1x32xf32>
    %cst_31 = arith.constant dense<0.000000e+00> : vector<8xf32>
    %55 = vector.multi_reduction <add>, %52, %cst_31 [1] : vector<8x32xf32> to vector<8xf32>
    %56 = vector.shape_cast %55 : vector<8xf32> to vector<8x1xf32>
    %cst_32 = arith.constant 3.200000e+01 : f32
    %57 = vector.broadcast %cst_32 : f32 to vector<8x1xf32>
    %58 = arith.divf %56, %57 : vector<8x1xf32>
    %59 = vector.broadcast %58 : vector<8x1xf32> to vector<8x32xf32>
    %60 = arith.subf %52, %59 : vector<8x32xf32>
    %61 = arith.mulf %60, %60 : vector<8x32xf32>
    %cst_33 = arith.constant dense<0.000000e+00> : vector<8xf32>
    %62 = vector.multi_reduction <add>, %61, %cst_33 [1] : vector<8x32xf32> to vector<8xf32>
    %63 = vector.shape_cast %62 : vector<8xf32> to vector<8x1xf32>
    %cst_34 = arith.constant 3.200000e+01 : f32
    %64 = vector.broadcast %cst_34 : f32 to vector<8x1xf32>
    %65 = arith.divf %63, %64 : vector<8x1xf32>
    %66 = vector.broadcast %58 : vector<8x1xf32> to vector<8x32xf32>
    %67 = arith.subf %52, %66 : vector<8x32xf32>
    %cst_35 = arith.constant 9.99999974E-6 : f32
    %68 = vector.broadcast %cst_35 : f32 to vector<8x1xf32>
    %69 = arith.addf %65, %68 : vector<8x1xf32>
    %70 = math.rsqrt %69 : vector<8x1xf32>
    %71 = vector.broadcast %70 : vector<8x1xf32> to vector<8x32xf32>
    %72 = arith.mulf %67, %71 : vector<8x32xf32>
    %73 = vector.broadcast %53 : vector<1x32xf32> to vector<8x32xf32>
    %74 = arith.mulf %72, %73 : vector<8x32xf32>
    %75 = vector.broadcast %54 : vector<1x32xf32> to vector<8x32xf32>
    %76 = arith.addf %74, %75 : vector<8x32xf32>
    %77 = arith.truncf %76 : vector<8x32xf32> to vector<8x32xbf16>
    %78 = vector.shape_cast %77 : vector<8x32xbf16> to vector<1x8x32xbf16>
    %79 = vector.shape_cast %78 : vector<1x8x32xbf16> to vector<1x8x32xbf16>
    %80 = vector.broadcast %79 : vector<1x8x32xbf16> to vector<4x8x32xbf16>
    %c1 = arith.constant 1 : index
    %c0_36 = arith.constant 0 : index
    %c0_37 = arith.constant 0 : index
    %c0_38 = arith.constant 0 : index
    %81 = vector.load %arg2[%c1, %c0_36, %c0_37, %c0_38] : memref<2x4x32x8xbf16, #tpu.memory_space<vmem>>, vector<1x4x32x8xbf16>
    %82 = vector.shape_cast %81 : vector<1x4x32x8xbf16> to vector<4x32x8xbf16>
    "tpu.trace_start"() <{level = 10 : i32, message = "hte,hef->htf"}> : () -> ()
    %cst_39 = arith.constant dense<0.000000e+00> : vector<4x8x8xf32>
    %83 = tpu.matmul %80, %82, %cst_39 {dimension_numbers = #tpu.dot_dimension_numbers<[2], [1], [1], [2], [0, 0, 0, 1, 1, 2], [0], [0]>} : vector<4x8x32xbf16>, vector<4x32x8xbf16>, vector<4x8x8xf32> -> vector<4x8x8xf32>
    "tpu.trace_stop"() : () -> ()
    %c1_40 = arith.constant 1 : index
    %c0_41 = arith.constant 0 : index
    %c0_42 = arith.constant 0 : index
    %c0_43 = arith.constant 0 : index
    %84 = vector.load %arg3[%c1_40, %c0_41, %c0_42, %c0_43] : memref<2x4x32x8xbf16, #tpu.memory_space<vmem>>, vector<1x4x32x8xbf16>
    %85 = vector.shape_cast %84 : vector<1x4x32x8xbf16> to vector<4x32x8xbf16>
    "tpu.trace_start"() <{level = 10 : i32, message = "hte,hef->htf"}> : () -> ()
    %cst_44 = arith.constant dense<0.000000e+00> : vector<4x8x8xf32>
    %86 = tpu.matmul %80, %85, %cst_44 {dimension_numbers = #tpu.dot_dimension_numbers<[2], [1], [1], [2], [0, 0, 0, 1, 1, 2], [0], [0]>} : vector<4x8x32xbf16>, vector<4x32x8xbf16>, vector<4x8x8xf32> -> vector<4x8x8xf32>
    "tpu.trace_stop"() : () -> ()
    %c1_45 = arith.constant 1 : index
    %c0_46 = arith.constant 0 : index
    %c0_47 = arith.constant 0 : index
    %c0_48 = arith.constant 0 : index
    %87 = vector.load %arg4[%c1_45, %c0_46, %c0_47, %c0_48] : memref<2x4x32x8xbf16, #tpu.memory_space<vmem>>, vector<1x4x32x8xbf16>
    %88 = vector.shape_cast %87 : vector<1x4x32x8xbf16> to vector<4x32x8xbf16>
    "tpu.trace_start"() <{level = 10 : i32, message = "hte,hef->htf"}> : () -> ()
    %cst_49 = arith.constant dense<0.000000e+00> : vector<4x8x8xf32>
    %89 = tpu.matmul %80, %88, %cst_49 {dimension_numbers = #tpu.dot_dimension_numbers<[2], [1], [1], [2], [0, 0, 0, 1, 1, 2], [0], [0]>} : vector<4x8x32xbf16>, vector<4x32x8xbf16>, vector<4x8x8xf32> -> vector<4x8x8xf32>
    "tpu.trace_stop"() : () -> ()
    %90 = arith.truncf %83 : vector<4x8x8xf32> to vector<4x8x8xbf16>
    %91 = arith.truncf %86 : vector<4x8x8xf32> to vector<4x8x8xbf16>
    "tpu.trace_start"() <{level = 10 : i32, message = "htf,hsf->hts"}> : () -> ()
    %cst_50 = arith.constant dense<0.000000e+00> : vector<4x8x8xf32>
    %92 = tpu.matmul %90, %91, %cst_50 {dimension_numbers = #tpu.dot_dimension_numbers<[2], [2], [1], [1], [0, 0, 0, 1, 1, 1], [0], [0]>} : vector<4x8x8xbf16>, vector<4x8x8xbf16>, vector<4x8x8xf32> -> vector<4x8x8xf32>
    "tpu.trace_stop"() : () -> ()
    %93 = vector.shape_cast %9 : vector<8x8xf32> to vector<1x8x8xf32>
    %94 = vector.broadcast %93 : vector<1x8x8xf32> to vector<4x8x8xf32>
    %95 = arith.addf %92, %94 : vector<4x8x8xf32>
    %cst_51 = arith.constant dense<0xFF800000> : vector<4x8xf32>
    %96 = vector.multi_reduction <maximumf>, %95, %cst_51 [2] : vector<4x8x8xf32> to vector<4x8xf32>
    %97 = vector.shape_cast %96 : vector<4x8xf32> to vector<4x8x1xf32>
    %98 = vector.broadcast %97 : vector<4x8x1xf32> to vector<4x8x8xf32>
    %99 = arith.subf %95, %98 : vector<4x8x8xf32>
    %100 = math.exp %99 : vector<4x8x8xf32>
    %cst_52 = arith.constant dense<0.000000e+00> : vector<4x8xf32>
    %101 = vector.multi_reduction <add>, %100, %cst_52 [2] : vector<4x8x8xf32> to vector<4x8xf32>
    %102 = vector.shape_cast %101 : vector<4x8xf32> to vector<4x8x1xf32>
    %103 = tpu.reciprocal %102 {approx = true} : vector<4x8x1xf32> -> vector<4x8x1xf32>
    %104 = vector.broadcast %103 : vector<4x8x1xf32> to vector<4x8x8xf32>
    %105 = arith.mulf %100, %104 : vector<4x8x8xf32>
    %106 = arith.truncf %105 : vector<4x8x8xf32> to vector<4x8x8xbf16>
    %107 = arith.truncf %89 : vector<4x8x8xf32> to vector<4x8x8xbf16>
    "tpu.trace_start"() <{level = 10 : i32, message = "hts,hsf->htf"}> : () -> ()
    %cst_53 = arith.constant dense<0.000000e+00> : vector<4x8x8xf32>
    %108 = tpu.matmul %106, %107, %cst_53 {dimension_numbers = #tpu.dot_dimension_numbers<[2], [1], [1], [2], [0, 0, 0, 1, 1, 2], [0], [0]>} : vector<4x8x8xbf16>, vector<4x8x8xbf16>, vector<4x8x8xf32> -> vector<4x8x8xf32>
    "tpu.trace_stop"() : () -> ()
    %109 = arith.truncf %108 : vector<4x8x8xf32> to vector<4x8x8xbf16>
    %c1_54 = arith.constant 1 : index
    %c0_55 = arith.constant 0 : index
    %c0_56 = arith.constant 0 : index
    %c0_57 = arith.constant 0 : index
    %110 = vector.load %arg5[%c1_54, %c0_55, %c0_56, %c0_57] : memref<2x4x8x32xbf16, #tpu.memory_space<vmem>>, vector<1x4x8x32xbf16>
    %111 = vector.shape_cast %110 : vector<1x4x8x32xbf16> to vector<4x8x32xbf16>
    "tpu.trace_start"() <{level = 10 : i32, message = "htf,hfe->hte"}> : () -> ()
    %cst_58 = arith.constant dense<0.000000e+00> : vector<4x8x32xf32>
    %112 = tpu.matmul %109, %111, %cst_58 {dimension_numbers = #tpu.dot_dimension_numbers<[2], [1], [1], [2], [0, 0, 0, 1, 1, 2], [0], [0]>} : vector<4x8x8xbf16>, vector<4x8x32xbf16>, vector<4x8x32xf32> -> vector<4x8x32xf32>
    "tpu.trace_stop"() : () -> ()
    %cst_59 = arith.constant dense<0.000000e+00> : vector<8x32xf32>
    %113 = vector.multi_reduction <add>, %112, %cst_59 [0] : vector<4x8x32xf32> to vector<8x32xf32>
    %c1_60 = arith.constant 1 : index
    %c0_61 = arith.constant 0 : index
    %c0_62 = arith.constant 0 : index
    %114 = vector.load %arg6[%c1_60, %c0_61, %c0_62] : memref<2x3x32xf32, #tpu.memory_space<vmem>>, vector<1x3x32xf32>
    %115 = vector.shape_cast %114 : vector<1x3x32xf32> to vector<3x32xf32>
    %116 = vector.extract_strided_slice %115 {offsets = [0, 0], sizes = [1, 32], strides = [1, 1]} : vector<3x32xf32> to vector<1x32xf32>
    %117 = vector.broadcast %116 : vector<1x32xf32> to vector<8x32xf32>
    %118 = arith.addf %113, %117 : vector<8x32xf32>
    %119 = arith.addf %118, %76 : vector<8x32xf32>
    %120 = vector.extract_strided_slice %115 {offsets = [1, 0], sizes = [1, 32], strides = [1, 1]} : vector<3x32xf32> to vector<1x32xf32>
    %121 = vector.extract_strided_slice %115 {offsets = [2, 0], sizes = [1, 32], strides = [1, 1]} : vector<3x32xf32> to vector<1x32xf32>
    %cst_63 = arith.constant dense<0.000000e+00> : vector<8xf32>
    %122 = vector.multi_reduction <add>, %119, %cst_63 [1] : vector<8x32xf32> to vector<8xf32>
    %123 = vector.shape_cast %122 : vector<8xf32> to vector<8x1xf32>
    %cst_64 = arith.constant 3.200000e+01 : f32
    %124 = vector.broadcast %cst_64 : f32 to vector<8x1xf32>
    %125 = arith.divf %123, %124 : vector<8x1xf32>
    %126 = vector.broadcast %125 : vector<8x1xf32> to vector<8x32xf32>
    %127 = arith.subf %119, %126 : vector<8x32xf32>
    %128 = arith.mulf %127, %127 : vector<8x32xf32>
    %cst_65 = arith.constant dense<0.000000e+00> : vector<8xf32>
    %129 = vector.multi_reduction <add>, %128, %cst_65 [1] : vector<8x32xf32> to vector<8xf32>
    %130 = vector.shape_cast %129 : vector<8xf32> to vector<8x1xf32>
    %cst_66 = arith.constant 3.200000e+01 : f32
    %131 = vector.broadcast %cst_66 : f32 to vector<8x1xf32>
    %132 = arith.divf %130, %131 : vector<8x1xf32>
    %133 = vector.broadcast %125 : vector<8x1xf32> to vector<8x32xf32>
    %134 = arith.subf %119, %133 : vector<8x32xf32>
    %cst_67 = arith.constant 9.99999974E-6 : f32
    %135 = vector.broadcast %cst_67 : f32 to vector<8x1xf32>
    %136 = arith.addf %132, %135 : vector<8x1xf32>
    %137 = math.rsqrt %136 : vector<8x1xf32>
    %138 = vector.broadcast %137 : vector<8x1xf32> to vector<8x32xf32>
    %139 = arith.mulf %134, %138 : vector<8x32xf32>
    %140 = vector.broadcast %120 : vector<1x32xf32> to vector<8x32xf32>
    %141 = arith.mulf %139, %140 : vector<8x32xf32>
    %142 = vector.broadcast %121 : vector<1x32xf32> to vector<8x32xf32>
    %143 = arith.addf %141, %142 : vector<8x32xf32>
    %144 = arith.truncf %143 : vector<8x32xf32> to vector<8x32xbf16>
    %c0_68 = arith.constant 0 : index
    %c0_69 = arith.constant 0 : index
    %c0_70 = arith.constant 0 : index
    %145 = vector.load %arg7[%c0_68, %c0_69, %c0_70] : memref<1x32x256xbf16, #tpu.memory_space<vmem>>, vector<1x32x256xbf16>
    %146 = vector.shape_cast %145 : vector<1x32x256xbf16> to vector<32x256xbf16>
    %cst_71 = arith.constant dense<0.000000e+00> : vector<8x256xf32>
    %147 = tpu.matmul %144, %146, %cst_71 {dimension_numbers = #tpu.dot_dimension_numbers<[1], [0], [0], [1], [0, 0, 1, 1], [], []>} : vector<8x32xbf16>, vector<32x256xbf16>, vector<8x256xf32> -> vector<8x256xf32>
    %c0_72 = arith.constant 0 : index
    %c0_73 = arith.constant 0 : index
    %c0_74 = arith.constant 0 : index
    %148 = vector.load %arg8[%c0_72, %c0_73, %c0_74] : memref<1x1x256xf32, #tpu.memory_space<vmem>>, vector<1x1x256xf32>
    %149 = vector.shape_cast %148 : vector<1x1x256xf32> to vector<1x256xf32>
    %150 = vector.broadcast %149 : vector<1x256xf32> to vector<8x256xf32>
    %151 = arith.addf %147, %150 : vector<8x256xf32>
    %cst_75 = arith.constant 0.000000e+00 : f32
    %152 = vector.broadcast %cst_75 : f32 to vector<8x256xf32>
    %153 = arith.maximumf %151, %152 : vector<8x256xf32>
    %154 = arith.truncf %153 : vector<8x256xf32> to vector<8x256xbf16>
    %c0_76 = arith.constant 0 : index
    %c0_77 = arith.constant 0 : index
    %c0_78 = arith.constant 0 : index
    %155 = vector.load %arg9[%c0_76, %c0_77, %c0_78] : memref<1x256x32xbf16, #tpu.memory_space<vmem>>, vector<1x256x32xbf16>
    %156 = vector.shape_cast %155 : vector<1x256x32xbf16> to vector<256x32xbf16>
    %cst_79 = arith.constant dense<0.000000e+00> : vector<8x32xf32>
    %157 = tpu.matmul %154, %156, %cst_79 {dimension_numbers = #tpu.dot_dimension_numbers<[1], [0], [0], [1], [0, 0, 1, 1], [], []>} : vector<8x256xbf16>, vector<256x32xbf16>, vector<8x32xf32> -> vector<8x32xf32>
    %c0_80 = arith.constant 0 : index
    %c0_81 = arith.constant 0 : index
    %c0_82 = arith.constant 0 : index
    %158 = vector.load %arg10[%c0_80, %c0_81, %c0_82] : memref<1x3x32xf32, #tpu.memory_space<vmem>>, vector<1x3x32xf32>
    %159 = vector.shape_cast %158 : vector<1x3x32xf32> to vector<3x32xf32>
    %160 = vector.extract_strided_slice %159 {offsets = [0, 0], sizes = [1, 32], strides = [1, 1]} : vector<3x32xf32> to vector<1x32xf32>
    %161 = vector.broadcast %160 : vector<1x32xf32> to vector<8x32xf32>
    %162 = arith.addf %157, %161 : vector<8x32xf32>
    %163 = arith.addf %162, %143 : vector<8x32xf32>
    %c0_83 = arith.constant 0 : index
    %c0_84 = arith.constant 0 : index
    %c0_85 = arith.constant 0 : index
    %164 = vector.load %arg10[%c0_83, %c0_84, %c0_85] : memref<1x3x32xf32, #tpu.memory_space<vmem>>, vector<1x3x32xf32>
    %165 = vector.shape_cast %164 : vector<1x3x32xf32> to vector<3x32xf32>
    %166 = vector.extract_strided_slice %165 {offsets = [1, 0], sizes = [1, 32], strides = [1, 1]} : vector<3x32xf32> to vector<1x32xf32>
    %c0_86 = arith.constant 0 : index
    %c0_87 = arith.constant 0 : index
    %c0_88 = arith.constant 0 : index
    %167 = vector.load %arg10[%c0_86, %c0_87, %c0_88] : memref<1x3x32xf32, #tpu.memory_space<vmem>>, vector<1x3x32xf32>
    %168 = vector.shape_cast %167 : vector<1x3x32xf32> to vector<3x32xf32>
    %169 = vector.extract_strided_slice %168 {offsets = [2, 0], sizes = [1, 32], strides = [1, 1]} : vector<3x32xf32> to vector<1x32xf32>
    %cst_89 = arith.constant dense<0.000000e+00> : vector<8xf32>
    %170 = vector.multi_reduction <add>, %163, %cst_89 [1] : vector<8x32xf32> to vector<8xf32>
    %171 = vector.shape_cast %170 : vector<8xf32> to vector<8x1xf32>
    %cst_90 = arith.constant 3.200000e+01 : f32
    %172 = vector.broadcast %cst_90 : f32 to vector<8x1xf32>
    %173 = arith.divf %171, %172 : vector<8x1xf32>
    %174 = vector.broadcast %173 : vector<8x1xf32> to vector<8x32xf32>
    %175 = arith.subf %163, %174 : vector<8x32xf32>
    %176 = arith.mulf %175, %175 : vector<8x32xf32>
    %cst_91 = arith.constant dense<0.000000e+00> : vector<8xf32>
    %177 = vector.multi_reduction <add>, %176, %cst_91 [1] : vector<8x32xf32> to vector<8xf32>
    %178 = vector.shape_cast %177 : vector<8xf32> to vector<8x1xf32>
    %cst_92 = arith.constant 3.200000e+01 : f32
    %179 = vector.broadcast %cst_92 : f32 to vector<8x1xf32>
    %180 = arith.divf %178, %179 : vector<8x1xf32>
    %181 = vector.broadcast %173 : vector<8x1xf32> to vector<8x32xf32>
    %182 = arith.subf %163, %181 : vector<8x32xf32>
    %cst_93 = arith.constant 9.99999974E-6 : f32
    %183 = vector.broadcast %cst_93 : f32 to vector<8x1xf32>
    %184 = arith.addf %180, %183 : vector<8x1xf32>
    %185 = math.rsqrt %184 : vector<8x1xf32>
    %186 = vector.broadcast %185 : vector<8x1xf32> to vector<8x32xf32>
    %187 = arith.mulf %182, %186 : vector<8x32xf32>
    %188 = vector.broadcast %166 : vector<1x32xf32> to vector<8x32xf32>
    %189 = arith.mulf %187, %188 : vector<8x32xf32>
    %190 = vector.broadcast %169 : vector<1x32xf32> to vector<8x32xf32>
    %191 = arith.addf %189, %190 : vector<8x32xf32>
    %c0_94 = arith.constant 0 : index
    %c0_95 = arith.constant 0 : index
    %192 = vector.load %arg11[%c0_94, %c0_95] : memref<8x32xf32, #tpu.memory_space<vmem>>, vector<8x32xf32>
    tpu.vector_store %arg11[%c0_94, %c0_95], %191 {strides = array<i32>} : memref<8x32xf32, #tpu.memory_space<vmem>>, vector<8x32xf32>,
    return
  }
  func.func @transform_0(%arg0: i32) -> (i32, i32) {
    %c0_i32 = arith.constant 0 : i32
    %c0_i32_0 = arith.constant 0 : i32
    %c0_i32_1 = arith.constant 0 : i32
    return %c0_i32, %c0_i32_0 : i32, i32
  }
  func.func @transform_1(%arg0: i32) -> (i32, i32, i32, i32) {
    %c0_i32 = arith.constant 0 : i32
    %c0_i32_0 = arith.constant 0 : i32
    %c0_i32_1 = arith.constant 0 : i32
    %c0_i32_2 = arith.constant 0 : i32
    return %arg0, %c0_i32, %c0_i32_0, %c0_i32_1 : i32, i32, i32, i32
  }
  func.func @transform_2(%arg0: i32) -> (i32, i32, i32, i32) {
    %c0_i32 = arith.constant 0 : i32
    %c0_i32_0 = arith.constant 0 : i32
    %c0_i32_1 = arith.constant 0 : i32
    %c0_i32_2 = arith.constant 0 : i32
    return %arg0, %c0_i32, %c0_i32_0, %c0_i32_1 : i32, i32, i32, i32
  }
  func.func @transform_3(%arg0: i32) -> (i32, i32, i32, i32) {
    %c0_i32 = arith.constant 0 : i32
    %c0_i32_0 = arith.constant 0 : i32
    %c0_i32_1 = arith.constant 0 : i32
    %c0_i32_2 = arith.constant 0 : i32
    return %arg0, %c0_i32, %c0_i32_0, %c0_i32_1 : i32, i32, i32, i32
  }
  func.func @transform_4(%arg0: i32) -> (i32, i32, i32, i32) {
    %c0_i32 = arith.constant 0 : i32
    %c0_i32_0 = arith.constant 0 : i32
    %c0_i32_1 = arith.constant 0 : i32
    %c0_i32_2 = arith.constant 0 : i32
    return %arg0, %c0_i32, %c0_i32_0, %c0_i32_1 : i32, i32, i32, i32
  }
  func.func @transform_5(%arg0: i32) -> (i32, i32, i32) {
    %c0_i32 = arith.constant 0 : i32
    %c0_i32_0 = arith.constant 0 : i32
    %c0_i32_1 = arith.constant 0 : i32
    return %arg0, %c0_i32, %c0_i32_0 : i32, i32, i32
  }
  func.func @transform_6(%arg0: i32) -> (i32, i32, i32) {
    %c0_i32 = arith.constant 0 : i32
    %c0_i32_0 = arith.constant 0 : i32
    %c0_i32_1 = arith.constant 0 : i32
    return %arg0, %c0_i32, %c0_i32_0 : i32, i32, i32
  }
  func.func @transform_7(%arg0: i32) -> (i32, i32, i32) {
    %c0_i32 = arith.constant 0 : i32
    %c0_i32_0 = arith.constant 0 : i32
    %c0_i32_1 = arith.constant 0 : i32
    return %arg0, %c0_i32, %c0_i32_0 : i32, i32, i32
  }
  func.func @transform_8(%arg0: i32) -> (i32, i32, i32) {
    %c0_i32 = arith.constant 0 : i32
    %c0_i32_0 = arith.constant 0 : i32
    %c0_i32_1 = arith.constant 0 : i32
    return %arg0, %c0_i32, %c0_i32_0 : i32, i32, i32
  }
  func.func @transform_9(%arg0: i32) -> (i32, i32, i32) {
    %c0_i32 = arith.constant 0 : i32
    %c0_i32_0 = arith.constant 0 : i32
    %c0_i32_1 = arith.constant 0 : i32
    return %arg0, %c0_i32, %c0_i32_0 : i32, i32, i32
  }
  func.func @transform_10(%arg0: i32) -> (i32, i32) {
    %c0_i32 = arith.constant 0 : i32
    %c0_i32_0 = arith.constant 0 : i32
    %c0_i32_1 = arith.constant 0 : i32
    return %c0_i32, %c0_i32_0 : i32, i32
  }
}

</mosaic_0001>

<bundles_post_ra>
// kernel: tpu_custom_call.1
= control target key start
LH: loop header
LB: loop body
LE: loop exit
PB: predicated region body
PF: predicated region fallthrough
CT: control target
= control target key end

     0   :  { %s5064_s0 = inlined_call_operand.vmem [shape: f32[8,32], index: 0, kind: input, shape index: {}]   ;;  %s5065_s1 = inlined_call_operand.vmem [shape: bf16[4,4,32,8], index: 1, kind: input, shape index: {}]   ;;  %s5066_s2 = inlined_call_operand.vmem [shape: bf16[4,4,32,8], index: 2, kind: input, shape index: {}]   ;;  %s5067_s3 = inlined_call_operand.vmem [shape: bf16[4,4,32,8], index: 3, kind: input, shape index: {}]   ;;  %s5068_s4 = inlined_call_operand.vmem [shape: bf16[4,4,8,32], index: 4, kind: input, shape index: {}]   ;;  %s5069_s5 = inlined_call_operand.vmem [shape: f32[4,3,32], index: 5, kind: input, shape index: {}]   ;;  %s5070_s6 = inlined_call_operand.vmem [shape: bf16[2,32,256], index: 6, kind: input, shape index: {}]   ;;  %s5071_s7 = inlined_call_operand.vmem [shape: f32[2,1,256], index: 7, kind: input, shape index: {}]   ;;  %s5072_s8 = inlined_call_operand.vmem [shape: bf16[2,256,32], index: 8, kind: input, shape index: {}]   ;;  %s5073_s9 = inlined_call_operand.vmem [shape: f32[2,3,32], index: 9, kind: input, shape index: {}]   ;;  %s5074_s10 = inlined_call_operand.hbm [shape: f32[8,32], index: 10, kind: output, shape index: {}]  }
   0x1   :  { %5076 = sst [smem:[#allocation6_spill]] %s5065_s1 }
   0x2   :  { %5077 = sst [smem:[#allocation7_spill]] %s5066_s2 }
   0x3   :  { %5078 = sst [smem:[#allocation8_spill]] %s5074_s10 }
   0x4   :  { %15 = vsyncpa [#allocation3], 0  ;;  %s4543_s13 = smov 0  }
   0x5 LB: > { %5079 = sst [smem:[#allocation5_spill]] %s4481_s13  ;;  %s4549_s14 = sadd.s32 4294967295, %s4481_s13   ;;  %s4481_s13 = sphi %s4543_s13, %s21_s13  }
   0x6   : > { %p3640_p0 = scmp.ge.s32.totalorder %s4481_s13, 1  ;;  %p395_p1 = scmp.lt.s32.totalorder %s4481_s13, 3 }
   0x8   : > { %p396_p2 = pnand %p3640_p0, %p395_p1 }
   0x9   : > { %s3641_s15 = sshll.u32 (!%p396_p2), %s4549_s14, 1  ;;  %p504_p3 = scmp.lt.s32.totalorder (!%p396_p2), %s4549_s14, 1 }
   0xa   : > { %399 = sbr.rel (%p396_p2) target bundleno = 3660 (0xe4c), region = 60  ;;  %p471_p4 = scmp.lt.s32.totalorder (!%p396_p2), %s3641_s15, 3 }
   0xb   : > { %s5080_s1 = sld [smem:[#allocation6_spill]] (!%p396_p2)  ;;  %p3661_p5 = scmp.ne.s32.totalorder (!%p396_p2), %s4549_s14, 0 }
   0xc   : > { %s5081_s2 = sld [smem:[#allocation7_spill]] (!%p396_p2) }
   0xf   : > { %s505_s16 = scalar_select %p504_p3, %s4549_s14, 1 }
  0x10   : > { %s5085_s15 = smov (!%p471_p4, %s3641_s15), 3 }
  0x11   : > { %s3840_s17 = sshll.u32 %s505_s16, 5  ;;  %s3657_s18 = sshll.u32 %s505_s16, 1 }
  0x12   : > { %s3836_s19 = sshll.u32 %s5085_s15, 6  ;;  %s3839_s20 = sshll.u32 %s5085_s15, 4 }
  0x13   : > { %s4559_s23 = scalar_lea.vmem %s5080_s1, %s3836_s19  ;;  %s4564_s26 = scalar_lea.vmem %s5081_s2, %s3836_s19 }
  0x14   : > { %s4569_s29 = scalar_lea.vmem %s5067_s3, %s3836_s19  ;;  %s4574_s12 = scalar_lea.vmem %s5068_s4, %s3839_s20 }
  0x15   : > { %s3654_s13 = sshll.u32 %s5085_s15, 2  ;;  %s4579_s22 = scalar_lea.vmem %s5070_s6, %s3840_s17 }
  0x16   : > { %s4584_s25 = scalar_lea.vmem %s5069_s5, %s3654_s13  ;;  %s4589_s19 = scalar_lea.vmem %s5071_s7, %s3657_s18 }
  0x17   : > { %s3841_s28 = sshll.u32 %s505_s16, 7  ;;  %s3660_s30 = sshll.u32 %s505_s16, 2 }
  0x18   : > { %s4594_s15 = scalar_lea.vmem %s5072_s8, %s3841_s28  ;;  %s4599_s21 = scalar_lea.vmem %s5073_s9, %s3660_s30 }
  0x19   : > { %526 = sbr.rel (%p3661_p5) target bundleno = 32 (0x20), region = 64 }
  0x1e   : > { %v527_v0 = vld [vmem:[%s5064_s0] sm:$0xff]  ;;  %vm528_vm0 = vcmask 261120  }
  0x1f   : > { %529 = vst.msk [vmem:[#allocation2] sm:$0xff] %vm528_vm0, %v527_v0 }
  0x20 PF: > { %v4339_v1 = vld [vmem:[%s4559_s23 + $0x8] sm:$0xff]   ;;  %v4483_v2 = vmov 0.0   ;;  %v4340_v3 = vld [vmem:[%s4559_s23 + $0x38] sm:$0xff]   ;;  %v4341_v4 = vld [vmem:[%s4559_s23] sm:$0xff]   ;;  %vm4484_vm1 = vmmov 0   ;;  %vm566_vm2 = vcmask 261120  }
  0x21   : > { %3984 = vmatprep.subr.bf16.mxu0 %v4483_v2  ;;  %4008 = vmatprep.subr.bf16.mxu1 %v4483_v2  ;;  %v4342_v5 = vld [vmem:[%s4559_s23 + $0x30] sm:$0xff]   ;;  %v4343_v8 = vld [vmem:[%s4559_s23 + $0x18] sm:$0xff]   ;;  %v4347_v12 = vld [vmem:[%s4559_s23 + $0x28] sm:$0xff]   ;;  %vm1222_vm3 = vcmask 64512   ;;  %vm1462_vm4 = vcmask 1043456   ;;  %s4487_s2 = smov [#allocation2]  }
  0x22   : > { %3985 = vmatpush3.bf16.msra.mxu0 %v4339_v1  ;;  %3988 = vmatprep.mubr.msk.bf16.mxu0 %vm4484_vm1, %v4483_v2  ;;  %v4344_v9 = vld [vmem:[%s4564_s26 + $0x18] sm:$0xff]   ;;  %v4345_v10 = vld [vmem:[%s4559_s23 + $0x10] sm:$0xff]   ;;  %v4349_v14 = vld [vmem:[%s4559_s23 + $0x20] sm:$0xff]   ;;  %s3502_s16 = sshll.u32 %s4487_s2, 4  ;;  %p4324_p6 = scmp.eq.s32.totalorder %s4549_s14, 1  ;;  %s3503_s16 = int_to_ptr.vmem [resolvable:$true] %s3502_s16 }
  0x23   : > { %4009 = vmatpush3.bf16.msra.mxu1 %v4340_v3  ;;  %3986 = vmatprep.subr.bf16.mxu0 %v4483_v2  ;;  %v4346_v11 = vld [vmem:[%s4564_s26 + $0x10] sm:$0xff]   ;;  %v4348_v13 = vld [vmem:[%s4564_s26 + $0x38] sm:$0xff]   ;;  %v4351_v16 = vld [vmem:[%s4564_s26 + $0x8] sm:$0xff]   ;;  %s4447_s18 = scalar_lea.vmem %s3503_s16, 128  ;;  %p4454_p10 = scmp.lt.s32.totalorder %s3503_s16, %s3503_s16 }
  0x24   : > { %4010 = vmatprep.subr.bf16.mxu1 %v4483_v2  ;;  %4012 = vmatprep.mubr.msk.bf16.mxu1 %vm4484_vm1, %v4483_v2  ;;  %v4350_v15 = vld [vmem:[%s4564_s26 + $0x30] sm:$0xff]   ;;  %v4355_v17 = vld [vmem:[%s4569_s29 + $0x18] sm:$0xff]   ;;  %v4352_v18 = vld [vmem:[%s4564_s26] sm:$0xff]   ;;  %p4448_p7 = scmp.ne.s32.totalorder %s3503_s16, %s4447_s18  ;;  %p4455_p11 = scmp.lt.s32.totalorder %s4447_s18, %s4447_s18 }
  0x25   : > { %v4353_v19 = vld [vmem:[%s4564_s26 + $0x28] sm:$0xff]   ;;  %v4354_v20 = vld [vmem:[%s4564_s26 + $0x20] sm:$0xff]   ;;  %v4356_v21 = vld [vmem:[%s4569_s29 + $0x10] sm:$0xff]  }
  0x26   : > { %v4617_v6 = vld [vmem:[#allocation2] sm:$0xff]  ;;  %3987 = vmatpush3.bf16.msra.mxu0 %v4341_v4  ;;  %v4357_v22 = vld [vmem:[%s4569_s29 + $0x38] sm:$0xff]   ;;  %v4358_v23 = vld [vmem:[%s4569_s29 + $0x8] sm:$0xff]   ;;  %p4449_p8 = pnand %p4448_p7, %p4324_p6  ;;  %p4456_p12 = por %p4455_p11, %p4454_p10 }
  0x27   : > { %v4621_v7 = vpack.c.bf16 %v4617_v6, %v4617_v6  ;;  %4011 = vmatpush3.bf16.msra.mxu1 %v4342_v5  ;;  %3992 = vmatprep.subr.bf16.mxu0 %v4483_v2  ;;  %v4359_v24 = vld [vmem:[%s4569_s29 + $0x30] sm:$0xff]   ;;  %v4360_v25 = vld [vmem:[%s4569_s29] sm:$0xff]   ;;  %v4361_v26 = vld [vmem:[%s4569_s29 + $0x28] sm:$0xff]  }
  0x28   : > { %4024 = vmatprep.subr.bf16.mxu1 %v4483_v2  ;;  %v4362_v27 = vld [vmem:[%s4569_s29 + $0x20] sm:$0xff]   ;;  %p4450_p9 = pneg %p4449_p8 }
  0x29   : > { %3989 = vmatmul.mubr.msk.bf16.vlgmr.msra.gmra.mxu0 %vm566_vm2, %v4621_v7 }
  0x2a   : > { %4013 = vmatmul.mubr.msk.bf16.vlgmr.msra.gmra.mxu1 %vm566_vm2, %v4621_v7  ;;  %3993 = vmatpush3.bf16.msra.mxu0 %v4343_v8  ;;  %p4457_p13 = pnand %p4456_p12, %p4450_p9 }
  0x2b   : > { %4025 = vmatpush3.bf16.msra.mxu1 %v4344_v9  ;;  %3994 = vmatprep.subr.bf16.mxu0 %v4483_v2 }
  0x2c   : > { %4026 = vmatprep.subr.bf16.mxu1 %v4483_v2  ;;  %3996 = vmatprep.mubr.msk.bf16.mxu0 %vm4484_vm1, %v4483_v2 }
  0x2d   : > { %4028 = vmatprep.mubr.msk.bf16.mxu1 %vm4484_vm1, %v4483_v2 }
  0x2e   : > { %3995 = vmatpush3.bf16.msra.mxu0 %v4345_v10 }
  0x2f   : > { %4027 = vmatpush3.bf16.msra.mxu1 %v4346_v11  ;;  %4000 = vmatprep.subr.bf16.mxu0 %v4483_v2 }
  0x30   : > { %4040 = vmatprep.subr.bf16.mxu1 %v4483_v2 }
  0x31   : > { %3997 = vmatmul.mubr.msk.bf16.vlgmr.msra.gmra.mxu0 %vm566_vm2, %v4621_v7 }
  0x32   : > { %4029 = vmatmul.mubr.msk.bf16.vlgmr.msra.gmra.mxu1 %vm566_vm2, %v4621_v7  ;;  %4001 = vmatpush3.bf16.msra.mxu0 %v4347_v12 }
  0x33   : > { %4041 = vmatpush3.bf16.msra.mxu1 %v4348_v13  ;;  %4002 = vmatprep.subr.bf16.mxu0 %v4483_v2 }
  0x34   : > { %4042 = vmatprep.subr.bf16.mxu1 %v4483_v2  ;;  %4004 = vmatprep.mubr.msk.bf16.mxu0 %vm4484_vm1, %v4483_v2 }
  0x35   : > { %4044 = vmatprep.mubr.msk.bf16.mxu1 %vm4484_vm1, %v4483_v2 }
  0x36   : > { %4003 = vmatpush3.bf16.msra.mxu0 %v4349_v14 }
  0x37   : > { %4043 = vmatpush3.bf16.msra.mxu1 %v4350_v15  ;;  %4016 = vmatprep.subr.bf16.mxu0 %v4483_v2 }
  0x38   : > { %4056 = vmatprep.subr.bf16.mxu1 %v4483_v2 }
  0x39   : > { %4005 = vmatmul.mubr.msk.bf16.vlgmr.msra.gmra.mxu0 %vm566_vm2, %v4621_v7 }
  0x3a   : > { %4045 = vmatmul.mubr.msk.bf16.vlgmr.msra.gmra.mxu1 %vm566_vm2, %v4621_v7  ;;  %4017 = vmatpush3.bf16.msra.mxu0 %v4351_v16 }
  0x3b   : > { %4018 = vmatprep.subr.bf16.mxu0 %v4483_v2  ;;  %4020 = vmatprep.mubr.msk.bf16.mxu0 %vm4484_vm1, %v4483_v2 }
  0x3c   : > { %4057 = vmatpush3.bf16.msra.mxu1 %v4355_v17  ;;  %4060 = vmatprep.mubr.msk.bf16.mxu1 %vm4484_vm1, %v4483_v2 }
  0x3d   : > { %4058 = vmatprep.subr.bf16.mxu1 %v4483_v2 }
  0x3e   : > { %4019 = vmatpush3.bf16.msra.mxu0 %v4352_v18 }
  0x3f   : > { %4032 = vmatprep.subr.bf16.mxu0 %v4483_v2 }
  0x40   : > { %4059 = vmatpush3.bf16.msra.mxu1 %v4356_v21 }
  0x41   : > { %4021 = vmatmul.mubr.msk.bf16.vlgmr.msra.gmra.mxu0 %vm566_vm2, %v4621_v7  ;;  %4072 = vmatprep.subr.bf16.mxu1 %v4483_v2 }
  0x42   : > { %4033 = vmatpush3.bf16.msra.mxu0 %v4353_v19  ;;  %4036 = vmatprep.mubr.msk.bf16.mxu0 %vm4484_vm1, %v4483_v2 }
  0x43   : > { %4034 = vmatprep.subr.bf16.mxu0 %v4483_v2  ;;  %4061 = vmatmul.mubr.msk.bf16.vlgmr.msra.gmra.mxu1 %vm566_vm2, %v4621_v7 }
  0x44   : > { %4073 = vmatpush3.bf16.msra.mxu1 %v4357_v22  ;;  %4076 = vmatprep.mubr.msk.bf16.mxu1 %vm4484_vm1, %v4483_v2 }
  0x45   : > { %4074 = vmatprep.subr.bf16.mxu1 %v4483_v2 }
  0x46   : > { %4035 = vmatpush3.bf16.msra.mxu0 %v4354_v20 }
  0x47   : > { %4048 = vmatprep.subr.bf16.mxu0 %v4483_v2 }
  0x48   : > { %4075 = vmatpush3.bf16.msra.mxu1 %v4359_v24 }
  0x49   : > { %4037 = vmatmul.mubr.msk.bf16.vlgmr.msra.gmra.mxu0 %vm566_vm2, %v4621_v7  ;;  %4086 = vmatprep.subr.bf16.mxu1 %v4483_v2 }
  0x4a   : > { %4052 = vmatprep.mubr.msk.bf16.mxu0 %vm4484_vm1, %v4483_v2  ;;  %4049 = vmatpush3.bf16.msra.mxu0 %v4358_v23 }
  0x4b   : > { %4050 = vmatprep.subr.bf16.mxu0 %v4483_v2  ;;  %4077 = vmatmul.mubr.msk.bf16.vlgmr.msra.gmra.mxu1 %vm566_vm2, %v4621_v7 }
  0x4c   : > { %4088 = vmatprep.mubr.msk.bf16.mxu1 %vm4484_vm1, %v4483_v2 }
  0x4e   : > { %4051 = vmatpush3.bf16.msra.mxu0 %v4360_v25 }
  0x4f   : > { %4064 = vmatprep.subr.bf16.mxu0 %v4483_v2 }
  0x51   : > { %4053 = vmatmul.mubr.msk.bf16.vlgmr.msra.gmra.mxu0 %vm566_vm2, %v4621_v7 }
  0x52   : > { %4065 = vmatpush3.bf16.msra.mxu0 %v4361_v26  ;;  %4068 = vmatprep.mubr.msk.bf16.mxu0 %vm4484_vm1, %v4483_v2 }
  0x53   : > { %4066 = vmatprep.subr.bf16.mxu0 %v4483_v2 }
  0x56   : > { %4067 = vmatpush3.bf16.msra.mxu0 %v4362_v27 }
  0x57   : > { %4080 = vmatprep.subr.bf16.mxu0 %v4483_v2 }
  0x59   : > { %4069 = vmatmul.mubr.msk.bf16.vlgmr.msra.gmra.mxu0 %vm566_vm2, %v4621_v7 }
  0x5a   : > { %4082 = vmatprep.mubr.msk.bf16.mxu0 %vm4484_vm1, %v4483_v2 }
  0xe9   : > { %v604_v28 = vpop.f32.mrf.mxu0 }
  0xea   : > { %v760_v29 = vpop.f32.mrf.mxu1  ;;  %v1214_v1 = vpack.c.bf16 %v604_v28, %v604_v28 }
  0xeb   : > { %v3990_v30 = vpop.f32.mrf.mxu0  ;;  %v1217_v59 = vpack.c.bf16 %v760_v29, %v760_v29 }
  0xec   : > { %v4014_v31 = vpop.f32.mrf.mxu1 }
  0xed   : > { %v607_v32 = vpop.f32.mrf.mxu0 }
  0xee   : > { %v763_v33 = vpop.f32.mrf.mxu1  ;;  %v531_v32 = vlaneseq }
  0xef   : > { %v3991_v34 = vpop.f32.mrf.mxu0 }
  0xf0   : > { %v4015_v35 = vpop.f32.mrf.mxu1 }
  0xf1   : > { %v656_v36 = vpop.f32.mrf.mxu0  ;;  %v4741_v35 = vshrl.u32 %v531_v32, 7 }
  0xf2   : > { %v880_v37 = vpop.f32.mrf.mxu1  ;;  %v1215_v48 = vpack.c.bf16 %v656_v36, %v656_v36  ;;  %v534_v36 = vand.u32 127, %v531_v32 }
  0xf3   : > { %v1219_v38 = vpack.c.bf16 %v880_v37, %v880_v37  ;;  %v3998_v39 = vpop.f32.mrf.mxu0 }
  0xf4   : > { %v4030_v40 = vpop.f32.mrf.mxu1  ;;  %vm535_vm5 = vcmp.ge.s32.totalorder %v4741_v35, %v534_v36 }
  0xf5   : > { %v1273_v41 = vsel %vm1222_vm3, %v1219_v38, 0  ;;  %v659_v42 = vpop.f32.mrf.mxu0 }
  0xf6   : > { %v883_v43 = vpop.f32.mrf.mxu1  ;;  %4087 = vmatpush3.bf16.xpose.msra.mxu1 %v1273_v41  ;;  %v4485_v41 = vmov -1e+30  }
  0xf7   : > { %v3999_v44 = vpop.f32.mrf.mxu0  ;;  %4098 = vmatprep.subr.bf16.mxu1 %v4483_v2  ;;  %v4744_v42 = vsel %vm535_vm5, 0.0, %v4485_v41 }
  0xf8   : > { %v4031_v45 = vpop.f32.mrf.mxu1 }
  0xf9   : > { %v708_v46 = vpop.f32.mrf.mxu0 }
  0xfa   : > { %v984_v47 = vpop.f32.mrf.mxu1  ;;  %v1216_v9 = vpack.c.bf16 %v708_v46, %v708_v46 }
  0xfb   : > { %v1221_v49 = vpack.c.bf16 %v984_v47, %v984_v47  ;;  %v4006_v50 = vpop.f32.mrf.mxu0 }
  0xfc   : > { %v4046_v51 = vpop.f32.mrf.mxu1 }
  0xfd   : > { %v1365_v52 = vsel %vm1222_vm3, %v1221_v49, 0  ;;  %4089 = vmatmul.mubr.msk.bf16.vlgmr.msra.gmra.mxu1 %vm1222_vm3, %v1215_v48  ;;  %v711_v53 = vpop.f32.mrf.mxu0 }
  0xfe   : > { %4099 = vmatpush3.bf16.xpose.msra.mxu1 %v1365_v52  ;;  %4100 = vmatprep.mubr.msk.bf16.mxu1 %vm4484_vm1, %v4483_v2  ;;  %v987_v54 = vpop.f32.mrf.mxu1 }
  0xff   : > { %v4007_v55 = vpop.f32.mrf.mxu0  ;;  %4110 = vmatprep.subr.bf16.mxu1 %v4483_v2 }
 0x100   : > { %v4047_v56 = vpop.f32.mrf.mxu1 }
 0x101   : > { %v828_v57 = vpop.f32.mrf.mxu0 }
 0x102   : > { %v1218_v58 = vpack.c.bf16 %v828_v57, %v828_v57 }
 0x103   : > { %v4022_v60 = vpop.f32.mrf.mxu0  ;;  %v1104_v10 = vpop.f32.mrf.mxu1 }
 0x104   : > { %v1227_v61 = vsel %vm1222_vm3, %v1218_v58, 0  ;;  %v1456_v11 = vpack.c.bf16 %v1104_v10, %v1104_v10 }
 0x105   : > { %4101 = vmatmul.mubr.msk.bf16.vlgmr.msra.gmra.mxu1 %vm1222_vm3, %v1217_v59  ;;  %v831_v62 = vpop.f32.mrf.mxu0  ;;  %4081 = vmatpush3.bf16.xpose.msra.mxu0 %v1227_v61  ;;  %v4062_v12 = vpop.f32.mrf.mxu1 }
 0x106   : > { %4092 = vmatprep.subr.bf16.mxu0 %v4483_v2  ;;  %4112 = vmatprep.mubr.msk.bf16.mxu1 %vm4484_vm1, %v4483_v2  ;;  %v1510_v13 = vsel %vm1462_vm4, %v1456_v11, 0 }
 0x107   : > { %v4023_v63 = vpop.f32.mrf.mxu0  ;;  %v1107_v14 = vpop.f32.mrf.mxu1  ;;  %4111 = vmatpush3.bf16.msra.mxu1 %v1510_v13 }
 0x108   : > { %4122 = vmatprep.subr.bf16.mxu1 %v4483_v2 }
 0x109   : > { %v932_v0 = vpop.f32.mrf.mxu0  ;;  %v4063_v15 = vpop.f32.mrf.mxu1 }
 0x10a   : > { %v1220_v3 = vpack.c.bf16 %v932_v0, %v932_v0 }
 0x10b   : > { %v4038_v4 = vpop.f32.mrf.mxu0  ;;  %v4735_v16 = vpop.f32.mrf.mxu1 }
 0x10c   : > { %v1319_v5 = vsel %vm1222_vm3, %v1220_v3, 0  ;;  %4083 = vmatmul.mubr.msk.bf16.vlgmr.msra.gmra.mxu0 %vm1222_vm3, %v1214_v1 }
 0x10d   : > { %v935_v7 = vpop.f32.mrf.mxu0  ;;  %4093 = vmatpush3.bf16.xpose.msra.mxu0 %v1319_v5  ;;  %4094 = vmatprep.mubr.msk.bf16.mxu0 %vm4484_vm1, %v4483_v2  ;;  %v4078_v18 = vpop.f32.mrf.mxu1 }
 0x10e   : > { %4104 = vmatprep.subr.bf16.mxu0 %v4483_v2 }
 0x10f   : > { %v4039_v8 = vpop.f32.mrf.mxu0  ;;  %v1211_v21 = vpop.f32.mrf.mxu1 }
 0x111   : > { %v1052_v17 = vpop.f32.mrf.mxu0  ;;  %v4079_v24 = vpop.f32.mrf.mxu1 }
 0x112   : > { %v1455_v19 = vpack.c.bf16 %v1052_v17, %v1052_v17 }
 0x113   : > { %v4054_v20 = vpop.f32.mrf.mxu0 }
 0x114   : > { %4095 = vmatmul.mubr.msk.bf16.vlgmr.msra.gmra.mxu0 %vm1222_vm3, %v1216_v9  ;;  %v1464_v22 = vsel %vm1462_vm4, %v1455_v19, 0 }
 0x115   : > { %4106 = vmatprep.mubr.msk.bf16.mxu0 %vm4484_vm1, %v4483_v2  ;;  %v1055_v23 = vpop.f32.mrf.mxu0  ;;  %4105 = vmatpush3.bf16.msra.mxu0 %v1464_v22 }
 0x116   : > { %4116 = vmatprep.subr.bf16.mxu0 %v4483_v2 }
 0x117   : > { %v4055_v25 = vpop.f32.mrf.mxu0 }
 0x119   : > { %v4739_v26 = vpop.f32.mrf.mxu0 }
 0x11a   : > { %v1457_v23 = vpack.c.bf16 %v4739_v26, %v4739_v26  ;;  %v1648_v26 = vld [vmem:[%s4574_s12] sm:$0xf] }
 0x11b   : > { %v4070_v27 = vpop.f32.mrf.mxu0  ;;  %v1656_v36 = vsel %vm1462_vm4, %v1648_v26, 0 }
 0x11d   : > { %v1159_v28 = vpop.f32.mrf.mxu0 }
 0x11e   : > { %v1458_v28 = vpack.c.bf16 %v4735_v16, %v4735_v16 }
 0x11f   : > { %v4071_v29 = vpop.f32.mrf.mxu0 }
 0x120   : > { %v1556_v29 = vsel %vm1462_vm4, %v1457_v23, 0 }
 0x1bd   : > { %v1309_v30 = vpop.f32.mrf.mxu1 }
 0x1be   : > { %v1310_v46 = vadd.f32 %v1309_v30, %v4744_v42 }
 0x1bf   : > { %v4090_v31 = vpop.f32.mrf.mxu1 }
 0x1c0   : > { %v1410_v50 = vsel %vm1222_vm3, %v1310_v46, -inf }
 0x1c1   : > { %v1312_v33 = vpop.f32.mrf.mxu1 }
 0x1c2   : > { %v1602_v33 = vsel %vm1462_vm4, %v1458_v28, 0 }
 0x1c3   : > { %v4091_v34 = vpop.f32.mrf.mxu1 }
 0x1c5   : > { %v1401_v37 = vpop.f32.mrf.mxu1 }
 0x1c6   : > { %v1402_v54 = vadd.f32 %v1401_v37, %v4744_v42 }
 0x1c7   : > { %v4102_v38 = vpop.f32.mrf.mxu1 }
 0x1c8   : > { %v1416_v58 = vsel %vm1222_vm3, %v1402_v54, -inf }
 0x1c9   : > { %v1404_v39 = vpop.f32.mrf.mxu1 }
 0x1cb   : > { %v4103_v40 = vpop.f32.mrf.mxu1 }
 0x1cc   : > { %v1263_v43 = vpop.f32.mrf.mxu0  ;;  %v1649_v40 = vld [vmem:[%s4574_s12 + $0x4] sm:$0xf] }
 0x1cd   : > { %v1264_v44 = vadd.f32 %v1263_v43, %v4744_v42  ;;  %v1702_v41 = vsel %vm1462_vm4, %v1649_v40, 0  ;;  %v1650_v43 = vld [vmem:[%s4574_s12 + $0x8] sm:$0xf] }
 0x1ce   : > { %v4084_v45 = vpop.f32.mrf.mxu0  ;;  %v4363_v40 = vld [vmem:[%s4559_s23 + $0x48] sm:$0xff]  }
 0x1cf   : > { %v1407_v47 = vsel %vm1222_vm3, %v1264_v44, -inf }
 0x1d0   : > { %1408 = vmax.xlane.f32.xlu0 %v1407_v47  ;;  %v1266_v48 = vpop.f32.mrf.mxu0 }
 0x1d1   : > { %v1651_v48 = vld [vmem:[%s4574_s12 + $0xc] sm:$0xf] }
 0x1d2   : > { %v4085_v49 = vpop.f32.mrf.mxu0 }
 0x1d4   : > { %1411 = vmax.xlane.f32.xlu0 %v1410_v50  ;;  %v1355_v51 = vpop.f32.mrf.mxu0 }
 0x1d5   : > { %v1356_v52 = vadd.f32 %v1355_v51, %v4744_v42 }
 0x1d6   : > { %v4096_v53 = vpop.f32.mrf.mxu0 }
 0x1d7   : > { %v1413_v55 = vsel %vm1222_vm3, %v1356_v52, -inf }
 0x1d8   : > { %1414 = vmax.xlane.f32.xlu1 %v1413_v55  ;;  %v1358_v56 = vpop.f32.mrf.mxu0 }
 0x1da   : > { %v4097_v57 = vpop.f32.mrf.mxu0 }
 0x1dc   : > { %1417 = vmax.xlane.f32.xlu1 %v1416_v58 }
 0x259   : > { %v1409_v59 = vpop.xlane.xlu0 %1408 }
 0x25a   : > { %v1419_v60 = vsub.f32 %v1264_v44, %v1409_v59 }
 0x25c   : > { %v1423_v61 = vmul.f32 1.442695, %v1419_v60 }
 0x25d   : > { %v1412_v62 = vpop.xlane.xlu0 %1411 }
 0x25e   : > { %4409 = vpow2.f32 %v1423_v61  ;;  %v1420_v63 = vsub.f32 %v1310_v46, %v1412_v62  ;;  %v1748_v46 = vsel %vm1462_vm4, %v1650_v43, 0  ;;  %v4366_v43 = vld [vmem:[%s4559_s23 + $0x50] sm:$0xff]  }
 0x260   : > { %v1425_v0 = vmul.f32 1.442695, %v1420_v63 }
 0x261   : > { %v1415_v1 = vpop.xlane.xlu1 %1414 }
 0x262   : > { %4411 = vpow2.f32 %v1425_v0  ;;  %v1421_v3 = vsub.f32 %v1356_v52, %v1415_v1  ;;  %v1794_v52 = vsel %vm1462_vm4, %v1651_v48, 0  ;;  %v4826_v48 = vsub.s32 2, %v4741_v35 }
 0x264   : > { %v1427_v4 = vmul.f32 1.442695, %v1421_v3 }
 0x265   : > { %v1418_v5 = vpop.xlane.xlu1 %1417 }
 0x266   : > { %4413 = vpow2.f32 %v1427_v4  ;;  %v1422_v7 = vsub.f32 %v1402_v54, %v1418_v5 }
 0x268   : > { %v1429_v8 = vmul.f32 1.442695, %v1422_v7 }
 0x26a   : > { %4415 = vpow2.f32 %v1429_v8 }
 0x26b   : > { %v4410_v9 = vpop.eup %4409 }
 0x26c   : > { %v1431_v10 = vsel %vm1222_vm3, %v4410_v9, 0.0 }
 0x26d   : > { %1432 = vadd.xlane.f32.xlu0 %v1431_v10 }
 0x26f   : > { %v4412_v11 = vpop.eup %4411 }
 0x270   : > { %v1434_v12 = vsel %vm1222_vm3, %v4412_v11, 0.0 }
 0x271   : > { %1435 = vadd.xlane.f32.xlu1 %v1434_v12 }
 0x273   : > { %v4414_v13 = vpop.eup %4413 }
 0x274   : > { %v1437_v14 = vsel %vm1222_vm3, %v4414_v13, 0.0 }
 0x275   : > { %1438 = vadd.xlane.f32.xlu0 %v1437_v14  ;;  %v4804_v14 = vsub.s32 0, %v4741_v35 }
 0x277   : > { %v4416_v15 = vpop.eup %4415 }
 0x278   : > { %v1440_v17 = vsel %vm1222_vm3, %v4416_v15, 0.0 }
 0x279   : > { %1441 = vadd.xlane.f32.xlu1 %v1440_v17 }
 0x2f6   : > { %v1433_v18 = vpop.xlane.xlu0 %1432 }
 0x2f7   : > { %4417 = vrcp.f32 %v1433_v18  ;;  %v1843_v18 = vld [vmem:[%s4584_s25] sm:$0x7] }
 0x2fa   : > { %v1436_v19 = vpop.xlane.xlu1 %1435 }
 0x2fb   : > { %4419 = vrcp.f32 %v1436_v19 }
 0x2fe   : > { %v1439_v20 = vpop.xlane.xlu0 %1438 }
 0x2ff   : > { %4421 = vrcp.f32 %v1439_v20 }
 0x302   : > { %v1442_v21 = vpop.xlane.xlu1 %1441 }
 0x303   : > { %4423 = vrcp.f32 %v1442_v21 }
 0x304   : > { %v4418_v22 = vpop.eup %4417 }
 0x305   : > { %v1447_v24 = vmul.f32 %v4418_v22, %v4410_v9 }
 0x307   : > { %v1451_v25 = vpack.c.bf16 %v1447_v24, %v1447_v24 }
 0x308   : > { %v4420_v27 = vpop.eup %4419 }
 0x309   : > { %4107 = vmatmul.mubr.msk.bf16.vlgmr.msra.gmra.mxu0 %vm1222_vm3, %v1451_v25  ;;  %v1448_v30 = vmul.f32 %v4420_v27, %v4412_v11  ;;  %v1847_v25 = vrot.slane %v1843_v18, %v4804_v14 }
 0x30a   : > { %4117 = vmatpush3.bf16.msra.mxu0 %v1556_v29  ;;  %4118 = vmatprep.mubr.msk.bf16.mxu0 %vm4484_vm1, %v4483_v2 }
 0x30b   : > { %v1452_v31 = vpack.c.bf16 %v1448_v30, %v1448_v30  ;;  %4128 = vmatprep.subr.bf16.mxu0 %v4483_v2 }
 0x30c   : > { %v4422_v32 = vpop.eup %4421 }
 0x30d   : > { %4113 = vmatmul.mubr.msk.bf16.vlgmr.msra.gmra.mxu1 %vm1222_vm3, %v1452_v31  ;;  %v1449_v16 = vmul.f32 %v4422_v32, %v4414_v13 }
 0x30e   : > { %4123 = vmatpush3.bf16.msra.mxu1 %v1602_v33  ;;  %4124 = vmatprep.mubr.msk.bf16.mxu1 %vm4484_vm1, %v4483_v2 }
 0x30f   : > { %v1453_v34 = vpack.c.bf16 %v1449_v16, %v1449_v16  ;;  %4134 = vmatprep.subr.bf16.mxu1 %v4483_v2 }
 0x310   : > { %v4424_v37 = vpop.eup %4423 }
 0x311   : > { %4119 = vmatmul.mubr.msk.bf16.vlgmr.msra.gmra.mxu0 %vm1222_vm3, %v1453_v34  ;;  %v1450_v38 = vmul.f32 %v4424_v37, %v4416_v15 }
 0x312   : > { %4129 = vmatpush3.bf16.msra.mxu0 %v1656_v36  ;;  %4130 = vmatprep.mubr.msk.bf16.mxu0 %vm4484_vm1, %v4483_v2 }
 0x313   : > { %v1454_v39 = vpack.c.bf16 %v1450_v38, %v1450_v38  ;;  %4140 = vmatprep.subr.bf16.mxu0 %v4483_v2 }
 0x315   : > { %4125 = vmatmul.mubr.msk.bf16.vlgmr.msra.gmra.mxu1 %vm1222_vm3, %v1454_v39 }
 0x316   : > { %4136 = vmatprep.mubr.msk.bf16.mxu1 %vm4484_vm1, %v4483_v2  ;;  %4135 = vmatpush3.bf16.msra.mxu1 %v1702_v41  ;;  %v4364_v41 = vld [vmem:[%s4559_s23 + $0x58] sm:$0xff]  }
 0x317   : > { %4146 = vmatprep.subr.bf16.mxu1 %v4483_v2 }
 0x3c9   : > { %v1500_v44 = vpop.f32.mrf.mxu0 }
 0x3ca   : > { %v1644_v45 = vpack.c.bf16 %v1500_v44, %v1500_v44 }
 0x3cb   : > { %v4108_v47 = vpop.f32.mrf.mxu0 }
 0x3cc   : > { %4131 = vmatmul.mubr.msk.bf16.vlgmr.msra.gmra.mxu0 %vm1222_vm3, %v1644_v45  ;;  %v4823_v47 = vsub.s32 1, %v4741_v35  ;;  %v4369_v35 = vld [vmem:[%s4559_s23 + $0x60] sm:$0xff]  }
 0x3cd   : > { %v1503_v49 = vpop.f32.mrf.mxu0  ;;  %v1546_v50 = vpop.f32.mrf.mxu1  ;;  %4141 = vmatpush3.bf16.msra.mxu0 %v1748_v46  ;;  %4142 = vmatprep.mubr.msk.bf16.mxu0 %vm4484_vm1, %v4483_v2 }
 0x3ce   : > { %v1645_v51 = vpack.c.bf16 %v1546_v50, %v1546_v50  ;;  %4152 = vmatprep.subr.bf16.mxu0 %v4483_v2  ;;  %v1867_v49 = vrot.slane %v1843_v18, %v4823_v47 }
 0x3cf   : > { %v4109_v53 = vpop.f32.mrf.mxu0  ;;  %v4114_v54 = vpop.f32.mrf.mxu1 }
 0x3d0   : > { %4137 = vmatmul.mubr.msk.bf16.vlgmr.msra.gmra.mxu1 %vm1222_vm3, %v1645_v51  ;;  %v1872_v51 = vrot.slane %v1843_v18, %v4826_v48 }
 0x3d1   : > { %v1549_v55 = vpop.f32.mrf.mxu1  ;;  %v1592_v56 = vpop.f32.mrf.mxu0  ;;  %4147 = vmatpush3.bf16.msra.mxu1 %v1794_v52  ;;  %4148 = vmatprep.mubr.msk.bf16.mxu1 %vm4484_vm1, %v4483_v2 }
 0x3d2   : > { %v1646_v57 = vpack.c.bf16 %v1592_v56, %v1592_v56  ;;  %4160 = vmatprep.subr.bf16.mxu1 %v4483_v2  ;;  %v4367_v55 = vld [vmem:[%s4559_s23 + $0x68] sm:$0xff]   ;;  %v4368_v56 = vld [vmem:[%s4559_s23 + $0x78] sm:$0xff]  }
 0x3d3   : > { %v4115_v58 = vpop.f32.mrf.mxu1  ;;  %v4120_v59 = vpop.f32.mrf.mxu0 }
 0x3d4   : > { %4143 = vmatmul.mubr.msk.bf16.vlgmr.msra.gmra.mxu0 %vm1222_vm3, %v1646_v57  ;;  %v4370_v58 = vld [vmem:[%s4559_s23 + $0x70] sm:$0xff]   ;;  %v4371_v59 = vld [vmem:[%s4564_s26 + $0x48] sm:$0xff]  }
 0x3d5   : > { %v1595_v60 = vpop.f32.mrf.mxu0  ;;  %v1638_v61 = vpop.f32.mrf.mxu1  ;;  %4156 = vmatprep.mubr.msk.bf16.mxu0 %vm4484_vm1, %v4483_v2  ;;  %4153 = vmatpush3.bf16.msra.mxu0 %v4363_v40 }
 0x3d6   : > { %v1647_v62 = vpack.c.bf16 %v1638_v61, %v1638_v61  ;;  %4154 = vmatprep.subr.bf16.mxu0 %v4483_v2  ;;  %v4372_v60 = vld [vmem:[%s4564_s26 + $0x58] sm:$0xff]   ;;  %v4373_v61 = vld [vmem:[%s4564_s26 + $0x40] sm:$0xff]  }
 0x3d7   : > { %v4121_v63 = vpop.f32.mrf.mxu0  ;;  %v4126_v0 = vpop.f32.mrf.mxu1 }
 0x3d8   : > { %4149 = vmatmul.mubr.msk.bf16.vlgmr.msra.gmra.mxu1 %vm1222_vm3, %v1647_v62  ;;  %v4374_v62 = vld [vmem:[%s4564_s26 + $0x50] sm:$0xff]   ;;  %v4375_v63 = vld [vmem:[%s4564_s26 + $0x68] sm:$0xff]   ;;  %v4376_v0 = vld [vmem:[%s4564_s26 + $0x78] sm:$0xff]  }
 0x3d9   : > { %v1641_v1 = vpop.f32.mrf.mxu1  ;;  %4164 = vmatprep.mubr.msk.bf16.mxu1 %vm4484_vm1, %v4483_v2  ;;  %4161 = vmatpush3.bf16.msra.mxu1 %v4364_v41 }
 0x3da   : > { %4162 = vmatprep.subr.bf16.mxu1 %v4483_v2  ;;  %v4377_v1 = vld [vmem:[%s4564_s26 + $0x60] sm:$0xff]  }
 0x3db   : > { %v4127_v3 = vpop.f32.mrf.mxu1 }
 0x3dc   : > { %v4378_v3 = vld [vmem:[%s4564_s26 + $0x70] sm:$0xff]  }
 0x3dd   : > { %4163 = vmatpush3.bf16.msra.mxu1 %v4366_v43 }
 0x3de   : > { %4176 = vmatprep.subr.bf16.mxu1 %v4483_v2 }
 0x48c   : > { %v1692_v4 = vpop.f32.mrf.mxu0 }
 0x48d   : > { %v1836_v15 = vsel %vm566_vm2, %v1692_v4, 0.0  ;;  %v4379_v4 = vld [vmem:[%s4569_s29 + $0x48] sm:$0xff]  }
 0x48e   : > { %v4132_v5 = vpop.f32.mrf.mxu0 }
 0x48f   : > { %v4380_v5 = vld [vmem:[%s4569_s29 + $0x58] sm:$0xff]  }
 0x490   : > { %v1695_v7 = vpop.f32.mrf.mxu0  ;;  %v1738_v8 = vpop.f32.mrf.mxu1 }
 0x491   : > { %v1837_v11 = vsel %vm566_vm2, %v1738_v8, 0.0  ;;  %v4381_v7 = vld [vmem:[%s4569_s29 + $0x40] sm:$0xff]   ;;  %v4382_v8 = vld [vmem:[%s4569_s29 + $0x50] sm:$0xff]  }
 0x492   : > { %v4133_v9 = vpop.f32.mrf.mxu0  ;;  %v4138_v10 = vpop.f32.mrf.mxu1  ;;  %v1838_v19 = vadd.f32 %v1837_v11, %v1836_v15  ;;  %v4385_v11 = vld [vmem:[%s4569_s29 + $0x60] sm:$0xff]  }
 0x493   : > { %v4383_v9 = vld [vmem:[%s4569_s29 + $0x68] sm:$0xff]   ;;  %v4384_v10 = vld [vmem:[%s4569_s29 + $0x78] sm:$0xff]  }
 0x494   : > { %v1741_v12 = vpop.f32.mrf.mxu1  ;;  %v1784_v13 = vpop.f32.mrf.mxu0 }
 0x495   : > { %v1839_v17 = vsel %vm566_vm2, %v1784_v13, 0.0  ;;  %v4386_v12 = vld [vmem:[%s4569_s29 + $0x70] sm:$0xff]  }
 0x496   : > { %v4139_v20 = vpop.f32.mrf.mxu1  ;;  %v4144_v21 = vpop.f32.mrf.mxu0  ;;  %v1840_v22 = vadd.f32 %v1839_v17, %v1838_v19 }
 0x498   : > { %v1787_v23 = vpop.f32.mrf.mxu0  ;;  %v1830_v24 = vpop.f32.mrf.mxu1 }
 0x499   : > { %v1841_v27 = vsel %vm566_vm2, %v1830_v24, 0.0 }
 0x49a   : > { %v1842_v28 = vadd.f32 %v1841_v27, %v1840_v22  ;;  %v4145_v29 = vpop.f32.mrf.mxu0  ;;  %v4150_v30 = vpop.f32.mrf.mxu1 }
 0x49c   : > { %v1848_v31 = vadd.f32 %v1847_v25, %v1842_v28  ;;  %v1833_v32 = vpop.f32.mrf.mxu1 }
 0x49e   : > { %v4151_v26 = vpop.f32.mrf.mxu1  ;;  %v1849_v33 = vadd.f32 %v1848_v31, %v4617_v6  ;;  %v4365_v6 = vld [vmem:[%s4559_s23 + $0x40] sm:$0xff]  }
 0x49f   : > { %4155 = vmatpush3.bf16.msra.mxu0 %v4365_v6 }
 0x4a0   : > { %v1850_v16 = vsel %vm566_vm2, %v1849_v33, 0.0  ;;  %4168 = vmatprep.subr.bf16.mxu0 %v4483_v2 }
 0x4a1   : > { %1851 = vadd.xlane.f32.xlu0 %v1850_v16 }
 0x52a   : > { %v1852_v34 = vpop.xlane.xlu0 %1851 }
 0x52b   : > { %v1854_v36 = vmul.f32 0.03125, %v1852_v34 }
 0x52d   : > { %v1855_v37 = vsub.f32 %v1849_v33, %v1854_v36 }
 0x52f   : > { %v1856_v38 = vmul.f32 %v1855_v37, %v1855_v37 }
 0x531   : > { %v1857_v39 = vsel %vm566_vm2, %v1856_v38, 0.0 }
 0x532   : > { %1858 = vadd.xlane.f32.xlu1 %v1857_v39 }
 0x5bb   : > { %v1859_v44 = vpop.xlane.xlu1 %1858 }
 0x5bc   : > { %v1860_v45 = vmul.f32 0.03125, %v1859_v44 }
 0x5be   : > { %v1861_v46 = vadd.f32 1e-05, %v1860_v45 }
 0x5c0   : > { %4425 = vrsqrt.f32 %v1861_v46 }
 0x5cd   : > { %v4426_v50 = vpop.eup %4425 }
 0x5ce   : > { %v1863_v52 = vmul.f32 %v4426_v50, %v1855_v37 }
 0x5d0   : > { %v1868_v53 = vmul.f32 %v1867_v49, %v1863_v52 }
 0x5d2   : > { %v4830_v54 = vadd.f32 %v1872_v51, %v1868_v53 }
 0x5d4   : > { %v4836_v57 = vpack.c.bf16 %v4830_v54, %v4830_v54 }
 0x5d6   : > { %4157 = vmatmul.mubr.msk.bf16.vlgmr.msra.gmra.mxu0 %vm566_vm2, %v4836_v57  ;;  %4165 = vmatmul.mubr.msk.bf16.vlgmr.msra.gmra.mxu1 %vm566_vm2, %v4836_v57 }
 0x5d7   : > { %4169 = vmatpush3.bf16.msra.mxu0 %v4367_v55  ;;  %4177 = vmatpush3.bf16.msra.mxu1 %v4368_v56 }
 0x5d8   : > { %4170 = vmatprep.subr.bf16.mxu0 %v4483_v2  ;;  %4178 = vmatprep.subr.bf16.mxu1 %v4483_v2 }
 0x5d9   : > { %4172 = vmatprep.mubr.msk.bf16.mxu0 %vm4484_vm1, %v4483_v2  ;;  %4180 = vmatprep.mubr.msk.bf16.mxu1 %vm4484_vm1, %v4483_v2 }
 0x5db   : > { %4171 = vmatpush3.bf16.msra.mxu0 %v4369_v35  ;;  %4179 = vmatpush3.bf16.msra.mxu1 %v4370_v58 }
 0x5dc   : > { %4184 = vmatprep.subr.bf16.mxu0 %v4483_v2  ;;  %4192 = vmatprep.subr.bf16.mxu1 %v4483_v2 }
 0x5de   : > { %4173 = vmatmul.mubr.msk.bf16.vlgmr.msra.gmra.mxu0 %vm566_vm2, %v4836_v57  ;;  %4181 = vmatmul.mubr.msk.bf16.vlgmr.msra.gmra.mxu1 %vm566_vm2, %v4836_v57 }
 0x5df   : > { %4185 = vmatpush3.bf16.msra.mxu0 %v4371_v59  ;;  %4193 = vmatpush3.bf16.msra.mxu1 %v4372_v60 }
 0x5e0   : > { %4186 = vmatprep.subr.bf16.mxu0 %v4483_v2  ;;  %4194 = vmatprep.subr.bf16.mxu1 %v4483_v2 }
 0x5e1   : > { %4188 = vmatprep.mubr.msk.bf16.mxu0 %vm4484_vm1, %v4483_v2  ;;  %4196 = vmatprep.mubr.msk.bf16.mxu1 %vm4484_vm1, %v4483_v2 }
 0x5e3   : > { %4187 = vmatpush3.bf16.msra.mxu0 %v4373_v61  ;;  %4195 = vmatpush3.bf16.msra.mxu1 %v4374_v62 }
 0x5e4   : > { %4200 = vmatprep.subr.bf16.mxu0 %v4483_v2  ;;  %4208 = vmatprep.subr.bf16.mxu1 %v4483_v2 }
 0x5e6   : > { %4189 = vmatmul.mubr.msk.bf16.vlgmr.msra.gmra.mxu0 %vm566_vm2, %v4836_v57  ;;  %4197 = vmatmul.mubr.msk.bf16.vlgmr.msra.gmra.mxu1 %vm566_vm2, %v4836_v57 }
 0x5e7   : > { %4201 = vmatpush3.bf16.msra.mxu0 %v4375_v63  ;;  %4209 = vmatpush3.bf16.msra.mxu1 %v4376_v0 }
 0x5e8   : > { %4202 = vmatprep.subr.bf16.mxu0 %v4483_v2  ;;  %4210 = vmatprep.subr.bf16.mxu1 %v4483_v2 }
 0x5e9   : > { %4204 = vmatprep.mubr.msk.bf16.mxu0 %vm4484_vm1, %v4483_v2  ;;  %4212 = vmatprep.mubr.msk.bf16.mxu1 %vm4484_vm1, %v4483_v2 }
 0x5eb   : > { %4203 = vmatpush3.bf16.msra.mxu0 %v4377_v1  ;;  %4211 = vmatpush3.bf16.msra.mxu1 %v4378_v3 }
 0x5ec   : > { %4216 = vmatprep.subr.bf16.mxu0 %v4483_v2  ;;  %4224 = vmatprep.subr.bf16.mxu1 %v4483_v2 }
 0x5ee   : > { %4205 = vmatmul.mubr.msk.bf16.vlgmr.msra.gmra.mxu0 %vm566_vm2, %v4836_v57  ;;  %4213 = vmatmul.mubr.msk.bf16.vlgmr.msra.gmra.mxu1 %vm566_vm2, %v4836_v57 }
 0x5ef   : > { %4217 = vmatpush3.bf16.msra.mxu0 %v4379_v4  ;;  %4225 = vmatpush3.bf16.msra.mxu1 %v4380_v5 }
 0x5f0   : > { %4218 = vmatprep.subr.bf16.mxu0 %v4483_v2  ;;  %4226 = vmatprep.subr.bf16.mxu1 %v4483_v2 }
 0x5f1   : > { %4220 = vmatprep.mubr.msk.bf16.mxu0 %vm4484_vm1, %v4483_v2  ;;  %4228 = vmatprep.mubr.msk.bf16.mxu1 %vm4484_vm1, %v4483_v2 }
 0x5f3   : > { %4219 = vmatpush3.bf16.msra.mxu0 %v4381_v7  ;;  %4227 = vmatpush3.bf16.msra.mxu1 %v4382_v8 }
 0x5f4   : > { %4232 = vmatprep.subr.bf16.mxu0 %v4483_v2  ;;  %4240 = vmatprep.subr.bf16.mxu1 %v4483_v2 }
 0x5f6   : > { %4221 = vmatmul.mubr.msk.bf16.vlgmr.msra.gmra.mxu0 %vm566_vm2, %v4836_v57  ;;  %4229 = vmatmul.mubr.msk.bf16.vlgmr.msra.gmra.mxu1 %vm566_vm2, %v4836_v57 }
 0x5f7   : > { %4233 = vmatpush3.bf16.msra.mxu0 %v4383_v9  ;;  %4241 = vmatpush3.bf16.msra.mxu1 %v4384_v10 }
 0x5f8   : > { %4234 = vmatprep.subr.bf16.mxu0 %v4483_v2  ;;  %4242 = vmatprep.subr.bf16.mxu1 %v4483_v2 }
 0x5f9   : > { %4236 = vmatprep.mubr.msk.bf16.mxu0 %vm4484_vm1, %v4483_v2  ;;  %4244 = vmatprep.mubr.msk.bf16.mxu1 %vm4484_vm1, %v4483_v2 }
 0x5fb   : > { %4235 = vmatpush3.bf16.msra.mxu0 %v4385_v11  ;;  %4243 = vmatpush3.bf16.msra.mxu1 %v4386_v12 }
 0x5fc   : > { %4248 = vmatprep.subr.bf16.mxu0 %v4483_v2  ;;  %4254 = vmatprep.subr.bf16.mxu1 %v4483_v2 }
 0x5fe   : > { %4237 = vmatmul.mubr.msk.bf16.vlgmr.msra.gmra.mxu0 %vm566_vm2, %v4836_v57  ;;  %4245 = vmatmul.mubr.msk.bf16.vlgmr.msra.gmra.mxu1 %vm566_vm2, %v4836_v57 }
 0x5ff   : > { %4250 = vmatprep.mubr.msk.bf16.mxu0 %vm4484_vm1, %v4483_v2  ;;  %4256 = vmatprep.mubr.msk.bf16.mxu1 %vm4484_vm1, %v4483_v2 }
 0x696   : > { %v1941_v13 = vpop.f32.mrf.mxu0  ;;  %v1993_v15 = vpop.f32.mrf.mxu1 }
 0x697   : > { %v2553_v45 = vpack.c.bf16 %v1941_v13, %v1941_v13  ;;  %v2554_v46 = vpack.c.bf16 %v1993_v15, %v1993_v15 }
 0x698   : > { %v4158_v17 = vpop.f32.mrf.mxu0  ;;  %v4166_v18 = vpop.f32.mrf.mxu1 }
 0x69a   : > { %v1944_v19 = vpop.f32.mrf.mxu0  ;;  %v1996_v20 = vpop.f32.mrf.mxu1 }
 0x69c   : > { %v4159_v21 = vpop.f32.mrf.mxu0  ;;  %v4167_v22 = vpop.f32.mrf.mxu1 }
 0x69e   : > { %v2045_v23 = vpop.f32.mrf.mxu0  ;;  %v2097_v24 = vpop.f32.mrf.mxu1 }
 0x69f   : > { %v2555_v61 = vpack.c.bf16 %v2045_v23, %v2045_v23  ;;  %v2556_v62 = vpack.c.bf16 %v2097_v24, %v2097_v24 }
 0x6a0   : > { %v4174_v25 = vpop.f32.mrf.mxu0  ;;  %v4182_v27 = vpop.f32.mrf.mxu1 }
 0x6a2   : > { %v2048_v28 = vpop.f32.mrf.mxu0  ;;  %v2100_v29 = vpop.f32.mrf.mxu1 }
 0x6a4   : > { %v4175_v30 = vpop.f32.mrf.mxu0  ;;  %v4183_v31 = vpop.f32.mrf.mxu1 }
 0x6a6   : > { %v2166_v32 = vpop.f32.mrf.mxu0  ;;  %v2218_v26 = vpop.f32.mrf.mxu1 }
 0x6a7   : > { %v2557_v33 = vpack.c.bf16 %v2166_v32, %v2166_v32  ;;  %v2558_v16 = vpack.c.bf16 %v2218_v26, %v2218_v26 }
 0x6a8   : > { %v4190_v34 = vpop.f32.mrf.mxu0  ;;  %v4198_v36 = vpop.f32.mrf.mxu1 }
 0x6a9   : > { %v2565_v37 = vsel %vm1222_vm3, %v2557_v33, 0  ;;  %v2611_v38 = vsel %vm1222_vm3, %v2558_v16, 0 }
 0x6aa   : > { %v2169_v39 = vpop.f32.mrf.mxu0  ;;  %v2221_v40 = vpop.f32.mrf.mxu1  ;;  %4249 = vmatpush3.bf16.xpose.msra.mxu0 %v2565_v37  ;;  %4255 = vmatpush3.bf16.xpose.msra.mxu1 %v2611_v38 }
 0x6ab   : > { %4260 = vmatprep.subr.bf16.mxu0 %v4483_v2  ;;  %4266 = vmatprep.subr.bf16.mxu1 %v4483_v2 }
 0x6ac   : > { %v4191_v41 = vpop.f32.mrf.mxu0  ;;  %v4199_v6 = vpop.f32.mrf.mxu1 }
 0x6ae   : > { %v2270_v43 = vpop.f32.mrf.mxu0  ;;  %v2322_v44 = vpop.f32.mrf.mxu1 }
 0x6af   : > { %v2559_v49 = vpack.c.bf16 %v2270_v43, %v2270_v43  ;;  %v2560_v50 = vpack.c.bf16 %v2322_v44, %v2322_v44 }
 0x6b0   : > { %v4206_v51 = vpop.f32.mrf.mxu0  ;;  %v4214_v52 = vpop.f32.mrf.mxu1 }
 0x6b1   : > { %v2657_v53 = vsel %vm1222_vm3, %v2559_v49, 0  ;;  %v2703_v55 = vsel %vm1222_vm3, %v2560_v50, 0  ;;  %4251 = vmatmul.mubr.msk.bf16.vlgmr.msra.gmra.mxu0 %vm1222_vm3, %v2553_v45  ;;  %4257 = vmatmul.mubr.msk.bf16.vlgmr.msra.gmra.mxu1 %vm1222_vm3, %v2554_v46 }
 0x6b2   : > { %v2273_v56 = vpop.f32.mrf.mxu0  ;;  %v2325_v57 = vpop.f32.mrf.mxu1  ;;  %4261 = vmatpush3.bf16.xpose.msra.mxu0 %v2657_v53  ;;  %4267 = vmatpush3.bf16.xpose.msra.mxu1 %v2703_v55 }
 0x6b3   : > { %4262 = vmatprep.mubr.msk.bf16.mxu0 %vm4484_vm1, %v4483_v2  ;;  %4268 = vmatprep.mubr.msk.bf16.mxu1 %vm4484_vm1, %v4483_v2 }
 0x6b4   : > { %v4207_v35 = vpop.f32.mrf.mxu0  ;;  %v4215_v58 = vpop.f32.mrf.mxu1  ;;  %4272 = vmatprep.subr.bf16.mxu0 %v4483_v2  ;;  %4278 = vmatprep.subr.bf16.mxu1 %v4483_v2 }
 0x6b6   : > { %v2391_v59 = vpop.f32.mrf.mxu0  ;;  %v2443_v60 = vpop.f32.mrf.mxu1 }
 0x6b7   : > { %v2793_v63 = vpack.c.bf16 %v2391_v59, %v2391_v59  ;;  %v2794_v0 = vpack.c.bf16 %v2443_v60, %v2443_v60 }
 0x6b8   : > { %v4222_v1 = vpop.f32.mrf.mxu0  ;;  %v4230_v3 = vpop.f32.mrf.mxu1 }
 0x6b9   : > { %v2801_v4 = vsel %vm1462_vm4, %v2793_v63, 0  ;;  %v2847_v5 = vsel %vm1462_vm4, %v2794_v0, 0  ;;  %4263 = vmatmul.mubr.msk.bf16.vlgmr.msra.gmra.mxu0 %vm1222_vm3, %v2555_v61  ;;  %4269 = vmatmul.mubr.msk.bf16.vlgmr.msra.gmra.mxu1 %vm1222_vm3, %v2556_v62 }
 0x6ba   : > { %v2394_v7 = vpop.f32.mrf.mxu0  ;;  %v2446_v8 = vpop.f32.mrf.mxu1  ;;  %4273 = vmatpush3.bf16.msra.mxu0 %v2801_v4  ;;  %4279 = vmatpush3.bf16.msra.mxu1 %v2847_v5 }
 0x6bb   : > { %4274 = vmatprep.mubr.msk.bf16.mxu0 %vm4484_vm1, %v4483_v2  ;;  %4280 = vmatprep.mubr.msk.bf16.mxu1 %vm4484_vm1, %v4483_v2 }
 0x6bc   : > { %v4223_v9 = vpop.f32.mrf.mxu0  ;;  %v4231_v10 = vpop.f32.mrf.mxu1  ;;  %4284 = vmatprep.subr.bf16.mxu0 %v4483_v2  ;;  %4290 = vmatprep.subr.bf16.mxu1 %v4483_v2 }
 0x6be   : > { %v4948_v11 = vpop.f32.mrf.mxu0  ;;  %v4950_v12 = vpop.f32.mrf.mxu1 }
 0x6bf   : > { %v2796_v10 = vpack.c.bf16 %v4950_v12, %v4950_v12 }
 0x6c0   : > { %v4238_v13 = vpop.f32.mrf.mxu0  ;;  %v4246_v15 = vpop.f32.mrf.mxu1 }
 0x6c1   : > { %v2795_v15 = vpack.c.bf16 %v4948_v11, %v4948_v11  ;;  %v3803_v11 = vld [vmem:[%s4574_s12 + $0x14] sm:$0xf] }
 0x6c2   : > { %v2498_v17 = vpop.f32.mrf.mxu0  ;;  %v2550_v18 = vpop.f32.mrf.mxu1 }
 0x6c4   : > { %v4239_v19 = vpop.f32.mrf.mxu0  ;;  %v4247_v20 = vpop.f32.mrf.mxu1 }
 0x6c5   : > { %v2939_v20 = vsel %vm1462_vm4, %v2796_v10, 0 }
 0x771   : > { %v2601_v21 = vpop.f32.mrf.mxu0  ;;  %v2647_v22 = vpop.f32.mrf.mxu1 }
 0x772   : > { %v2602_v23 = vadd.f32 %v2601_v21, %v4744_v42  ;;  %v2648_v24 = vadd.f32 %v2647_v22, %v4744_v42  ;;  %v2893_v21 = vsel %vm1462_vm4, %v2795_v15, 0 }
 0x773   : > { %v4252_v25 = vpop.f32.mrf.mxu0  ;;  %v4258_v27 = vpop.f32.mrf.mxu1 }
 0x774   : > { %v2748_v28 = vsel %vm1222_vm3, %v2648_v24, -inf  ;;  %v2745_v29 = vsel %vm1222_vm3, %v2602_v23, -inf }
 0x775   : > { %2749 = vmax.xlane.f32.xlu1 %v2748_v28  ;;  %v2650_v30 = vpop.f32.mrf.mxu1  ;;  %2746 = vmax.xlane.f32.xlu0 %v2745_v29  ;;  %v2604_v31 = vpop.f32.mrf.mxu0  ;;  %v3040_v28 = vsel %vm1462_vm4, %v3803_v11, 0 }
 0x776   : > { %v3805_v31 = vld [vmem:[%s4574_s12 + $0x1c] sm:$0xf] }
 0x777   : > { %v4253_v32 = vpop.f32.mrf.mxu0  ;;  %v4259_v26 = vpop.f32.mrf.mxu1 }
 0x778   : > { %v3804_v32 = vld [vmem:[%s4574_s12 + $0x18] sm:$0xf] }
 0x779   : > { %v2693_v33 = vpop.f32.mrf.mxu0  ;;  %v2739_v16 = vpop.f32.mrf.mxu1 }
 0x77a   : > { %v2694_v34 = vadd.f32 %v2693_v33, %v4744_v42  ;;  %v2740_v36 = vadd.f32 %v2739_v16, %v4744_v42 }
 0x77b   : > { %v4264_v37 = vpop.f32.mrf.mxu0  ;;  %v4270_v38 = vpop.f32.mrf.mxu1 }
 0x77c   : > { %v2754_v39 = vsel %vm1222_vm3, %v2740_v36, -inf  ;;  %v2751_v40 = vsel %vm1222_vm3, %v2694_v34, -inf  ;;  %v3086_v38 = vsel %vm1462_vm4, %v3804_v32, 0  ;;  %v4393_v32 = vld [vmem:[%s4594_s15 + $0x78] sm:$0xff]  }
 0x77d   : > { %2755 = vmax.xlane.f32.xlu1 %v2754_v39  ;;  %v2742_v41 = vpop.f32.mrf.mxu1  ;;  %2752 = vmax.xlane.f32.xlu0 %v2751_v40  ;;  %v2696_v6 = vpop.f32.mrf.mxu0 }
 0x77f   : > { %v4265_v43 = vpop.f32.mrf.mxu0  ;;  %v4271_v44 = vpop.f32.mrf.mxu1 }
 0x7fe   : > { %v2750_v45 = vpop.xlane.xlu1 %2749  ;;  %v2747_v46 = vpop.xlane.xlu0 %2746 }
 0x7ff   : > { %v2758_v49 = vsub.f32 %v2648_v24, %v2750_v45  ;;  %v2757_v50 = vsub.f32 %v2602_v23, %v2747_v46  ;;  %v3802_v24 = vld [vmem:[%s4574_s12 + $0x10] sm:$0xf] }
 0x800   : > { %v2994_v30 = vsel %vm1462_vm4, %v3802_v24, 0 }
 0x801   : > { %v2763_v51 = vmul.f32 1.442695, %v2758_v49  ;;  %v2761_v52 = vmul.f32 1.442695, %v2757_v50 }
 0x803   : > { %4427 = vpow2.f32 %v2763_v51 }
 0x804   : > { %4429 = vpow2.f32 %v2761_v52 }
 0x806   : > { %v2756_v42 = vpop.xlane.xlu1 %2755  ;;  %v2753_v53 = vpop.xlane.xlu0 %2752 }
 0x807   : > { %v2760_v55 = vsub.f32 %v2740_v36, %v2756_v42  ;;  %v2759_v56 = vsub.f32 %v2694_v34, %v2753_v53  ;;  %v3132_v34 = vsel %vm1462_vm4, %v3805_v31, 0  ;;  %v4486_v31 = vmov 0  }
 0x809   : > { %v2767_v57 = vmul.f32 1.442695, %v2760_v55  ;;  %v2765_v35 = vmul.f32 1.442695, %v2759_v56 }
 0x80b   : > { %4431 = vpow2.f32 %v2767_v57 }
 0x80c   : > { %4433 = vpow2.f32 %v2765_v35 }
 0x810   : > { %v4428_v58 = vpop.eup %4427 }
 0x811   : > { %v4430_v59 = vpop.eup %4429  ;;  %v2772_v60 = vsel %vm1222_vm3, %v4428_v58, 0.0 }
 0x812   : > { %2773 = vadd.xlane.f32.xlu1 %v2772_v60  ;;  %v2769_v61 = vsel %vm1222_vm3, %v4430_v59, 0.0 }
 0x813   : > { %2770 = vadd.xlane.f32.xlu0 %v2769_v61 }
 0x818   : > { %v4432_v62 = vpop.eup %4431 }
 0x819   : > { %v4434_v63 = vpop.eup %4433  ;;  %v2778_v0 = vsel %vm1222_vm3, %v4432_v62, 0.0 }
 0x81a   : > { %2779 = vadd.xlane.f32.xlu1 %v2778_v0  ;;  %v2775_v1 = vsel %vm1222_vm3, %v4434_v63, 0.0 }
 0x81b   : > { %2776 = vadd.xlane.f32.xlu0 %v2775_v1  ;;  %v5005_v1 = vld [vmem:[%s4584_s25 + $0x4] sm:$0x7] }
 0x89b   : > { %v2774_v3 = vpop.xlane.xlu1 %2773 }
 0x89c   : > { %4435 = vrcp.f32 %v2774_v3  ;;  %v2771_v4 = vpop.xlane.xlu0 %2770 }
 0x89d   : > { %4437 = vrcp.f32 %v2771_v4 }
 0x8a3   : > { %v2780_v5 = vpop.xlane.xlu1 %2779 }
 0x8a4   : > { %4439 = vrcp.f32 %v2780_v5  ;;  %v2777_v7 = vpop.xlane.xlu0 %2776 }
 0x8a5   : > { %4441 = vrcp.f32 %v2777_v7 }
 0x8a9   : > { %v4436_v8 = vpop.eup %4435 }
 0x8aa   : > { %v4438_v9 = vpop.eup %4437  ;;  %v2786_v13 = vmul.f32 %v4436_v8, %v4428_v58 }
 0x8ab   : > { %v2785_v17 = vmul.f32 %v4438_v9, %v4430_v59  ;;  %v3186_v9 = vrot.slane %v5005_v1, %v4804_v14 }
 0x8ac   : > { %v2790_v18 = vpack.c.bf16 %v2786_v13, %v2786_v13 }
 0x8ad   : > { %v2789_v19 = vpack.c.bf16 %v2785_v17, %v2785_v17 }
 0x8ae   : > { %4281 = vmatmul.mubr.msk.bf16.vlgmr.msra.gmra.mxu1 %vm1222_vm3, %v2790_v18 }
 0x8af   : > { %4275 = vmatmul.mubr.msk.bf16.vlgmr.msra.gmra.mxu0 %vm1222_vm3, %v2789_v19  ;;  %4291 = vmatpush3.bf16.msra.mxu1 %v2939_v20 }
 0x8b0   : > { %4285 = vmatpush3.bf16.msra.mxu0 %v2893_v21  ;;  %4286 = vmatprep.mubr.msk.bf16.mxu0 %vm4484_vm1, %v4483_v2 }
 0x8b1   : > { %v4440_v12 = vpop.eup %4439  ;;  %4292 = vmatprep.mubr.msk.bf16.mxu1 %vm4484_vm1, %v4483_v2  ;;  %4296 = vmatprep.subr.bf16.mxu0 %v4483_v2 }
 0x8b2   : > { %v4442_v22 = vpop.eup %4441  ;;  %v2788_v23 = vmul.f32 %v4440_v12, %v4432_v62  ;;  %4302 = vmatprep.subr.bf16.mxu1 %v4483_v2 }
 0x8b3   : > { %v2787_v25 = vmul.f32 %v4442_v22, %v4434_v63 }
 0x8b4   : > { %v2792_v27 = vpack.c.bf16 %v2788_v23, %v2788_v23 }
 0x8b5   : > { %v2791_v29 = vpack.c.bf16 %v2787_v25, %v2787_v25 }
 0x8b6   : > { %4293 = vmatmul.mubr.msk.bf16.vlgmr.msra.gmra.mxu1 %vm1222_vm3, %v2792_v27 }
 0x8b7   : > { %4287 = vmatmul.mubr.msk.bf16.vlgmr.msra.gmra.mxu0 %vm1222_vm3, %v2791_v29  ;;  %4303 = vmatpush3.bf16.msra.mxu1 %v3040_v28  ;;  %v4389_v28 = vld [vmem:[%s4579_s22 + $0x14] ss:$8 sps:$4 sm:$0xff]   ;;  %v4387_v29 = vld [vmem:[%s4579_s22 + $0x10] ss:$8 sps:$4 sm:$0xff]  }
 0x8b8   : > { %4297 = vmatpush3.bf16.msra.mxu0 %v2994_v30  ;;  %4298 = vmatprep.mubr.msk.bf16.mxu0 %vm4484_vm1, %v4483_v2  ;;  %v4392_v30 = vld [vmem:[%s4579_s22 + $0x4] ss:$8 sps:$4 sm:$0xff]  }
 0x8b9   : > { %4304 = vmatprep.mubr.msk.bf16.mxu1 %vm4484_vm1, %v4483_v2  ;;  %4308 = vmatprep.subr.bf16.mxu0 %v4483_v2 }
 0x8ba   : > { %4314 = vmatprep.subr.bf16.mxu1 %v4483_v2 }
 0x96e   : > { %v2883_v26 = vpop.f32.mrf.mxu1 }
 0x96f   : > { %v2837_v33 = vpop.f32.mrf.mxu0  ;;  %v2982_v16 = vpack.c.bf16 %v2883_v26, %v2883_v26  ;;  %v4394_v26 = vld [vmem:[%s4594_s15 + $0x38] sm:$0xff]  }
 0x970   : > { %v2981_v36 = vpack.c.bf16 %v2837_v33, %v2837_v33  ;;  %v4282_v37 = vpop.f32.mrf.mxu1  ;;  %v4395_v33 = vld [vmem:[%s4594_s15 + $0x70] sm:$0xff]  }
 0x971   : > { %v4276_v39 = vpop.f32.mrf.mxu0  ;;  %4305 = vmatmul.mubr.msk.bf16.vlgmr.msra.gmra.mxu1 %vm1222_vm3, %v2982_v16  ;;  %v4396_v16 = vld [vmem:[%s4594_s15 + $0x30] sm:$0xff]   ;;  %v4399_v37 = vld [vmem:[%s4594_s15 + $0x60] sm:$0xff]  }
 0x972   : > { %4299 = vmatmul.mubr.msk.bf16.vlgmr.msra.gmra.mxu0 %vm1222_vm3, %v2981_v36  ;;  %v2886_v40 = vpop.f32.mrf.mxu1  ;;  %4315 = vmatpush3.bf16.msra.mxu1 %v3132_v34  ;;  %v4397_v34 = vld [vmem:[%s4594_s15 + $0x68] sm:$0xff]   ;;  %v4401_v39 = vld [vmem:[%s4594_s15 + $0x58] sm:$0xff]  }
 0x973   : > { %v2840_v41 = vpop.f32.mrf.mxu0  ;;  %4309 = vmatpush3.bf16.msra.mxu0 %v3086_v38  ;;  %4310 = vmatprep.mubr.msk.bf16.mxu0 %vm4484_vm1, %v4483_v2  ;;  %v4398_v36 = vld [vmem:[%s4594_s15 + $0x28] sm:$0xff]   ;;  %v4400_v38 = vld [vmem:[%s4594_s15 + $0x20] sm:$0xff]   ;;  %v4402_v40 = vld [vmem:[%s4594_s15 + $0x18] sm:$0xff]  }
 0x974   : > { %v4283_v6 = vpop.f32.mrf.mxu1  ;;  %4316 = vmatprep.mubr.msk.bf16.mxu1 %vm4484_vm1, %v4483_v2  ;;  %3264 = vmatprep.subr.bf16.mxu0 %v4389_v28  ;;  %v4403_v41 = vld [vmem:[%s4594_s15 + $0x50] sm:$0xff]  }
 0x975   : > { %v4277_v43 = vpop.f32.mrf.mxu0  ;;  %3962 = vmatprep.subr.bf16.mxu1 %v4393_v32  ;;  %v4404_v6 = vld [vmem:[%s4594_s15 + $0x10] sm:$0xff]  }
 0x976   : > { %v2975_v44 = vpop.f32.mrf.mxu1 }
 0x977   : > { %v2929_v45 = vpop.f32.mrf.mxu0  ;;  %v2984_v46 = vpack.c.bf16 %v2975_v44, %v2975_v44 }
 0x978   : > { %v2983_v49 = vpack.c.bf16 %v2929_v45, %v2929_v45  ;;  %v4294_v50 = vpop.f32.mrf.mxu1 }
 0x979   : > { %v4288_v51 = vpop.f32.mrf.mxu0  ;;  %4317 = vmatmul.mubr.msk.bf16.vlgmr.msra.gmra.mxu1 %vm1222_vm3, %v2984_v46  ;;  %v3205_v46 = vrot.slane %v5005_v1, %v4823_v47  ;;  %v3210_v50 = vrot.slane %v5005_v1, %v4826_v48 }
 0x97a   : > { %4311 = vmatmul.mubr.msk.bf16.vlgmr.msra.gmra.mxu0 %vm1222_vm3, %v2983_v49  ;;  %v2978_v52 = vpop.f32.mrf.mxu1  ;;  %3963 = vmatpush3.bf16.msra.mxu1 %v4394_v26 }
 0x97b   : > { %v2932_v42 = vpop.f32.mrf.mxu0  ;;  %3265 = vmatpush1.bf16.msra.mxu0 %v4387_v29  ;;  %3284 = vmatprep.mubr.bf16.mxu0 %v4486_v31 }
 0x97c   : > { %v4295_v53 = vpop.f32.mrf.mxu1  ;;  %3266 = vmatprep.subr.bf16.mxu0 %v4392_v30  ;;  %3964 = vmatprep.subr.bf16.mxu1 %v4395_v33 }
 0x97d   : > { %v4289_v55 = vpop.f32.mrf.mxu0 }
 0x97e   : > { %3965 = vmatpush3.bf16.msra.mxu1 %v4396_v16  ;;  %v4405_v55 = vld [vmem:[%s4594_s15 + $0x48] sm:$0xff]  }
 0x97f   : > { %3966 = vmatprep.subr.bf16.mxu1 %v4397_v34 }
 0x982   : > { %3967 = vmatpush3.bf16.msra.mxu1 %v4398_v36 }
 0x983   : > { %3968 = vmatprep.subr.bf16.mxu1 %v4399_v37 }
 0x986   : > { %3969 = vmatpush3.bf16.msra.mxu1 %v4400_v38 }
 0x987   : > { %3970 = vmatprep.subr.bf16.mxu1 %v4401_v39 }
 0x98a   : > { %3971 = vmatpush3.bf16.msra.mxu1 %v4402_v40 }
 0x98b   : > { %3972 = vmatprep.subr.bf16.mxu1 %v4403_v41 }
 0x98e   : > { %3973 = vmatpush3.bf16.msra.mxu1 %v4404_v6 }
 0x98f   : > { %3974 = vmatprep.subr.bf16.mxu1 %v4405_v55 }
 0xa31   : > { %v3076_v56 = vpop.f32.mrf.mxu1 }
 0xa32   : > { %v3030_v57 = vpop.f32.mrf.mxu0  ;;  %v3175_v61 = vsel %vm566_vm2, %v3076_v56, 0.0  ;;  %v4406_v56 = vld [vmem:[%s4594_s15 + $0x8] sm:$0xff]  }
 0xa33   : > { %v4306_v35 = vpop.f32.mrf.mxu1  ;;  %v3174_v60 = vsel %vm566_vm2, %v3030_v57, 0.0  ;;  %3975 = vmatpush3.bf16.msra.mxu1 %v4406_v56  ;;  %v4407_v57 = vld [vmem:[%s4594_s15 + $0x40] sm:$0xff]  }
 0xa34   : > { %v4300_v2 = vpop.f32.mrf.mxu0  ;;  %v3176_v3 = vadd.f32 %v3175_v61, %v3174_v60  ;;  %v4408_v35 = vld [vmem:[%s4594_s15] sm:$0xff]   ;;  %3976 = vmatprep.subr.bf16.mxu1 %v4407_v57 }
 0xa35   : > { %v3079_v58 = vpop.f32.mrf.mxu1  ;;  %v3217_v2 = vld [vmem:[%s4589_s19] sm:$0x3] }
 0xa36   : > { %v3033_v59 = vpop.f32.mrf.mxu0  ;;  %v3222_v58 = vrot.slane %v3217_v2, %v4804_v14 }
 0xa37   : > { %v4307_v62 = vpop.f32.mrf.mxu1  ;;  %3977 = vmatpush3.bf16.msra.mxu1 %v4408_v35  ;;  %v3226_v59 = vrot.slane %v3217_v2, %v4823_v47 }
 0xa38   : > { %v4301_v63 = vpop.f32.mrf.mxu0 }
 0xa39   : > { %v3168_v0 = vpop.f32.mrf.mxu1 }
 0xa3a   : > { %v3122_v4 = vpop.f32.mrf.mxu0  ;;  %v3179_v13 = vsel %vm566_vm2, %v3168_v0, 0.0 }
 0xa3b   : > { %v3177_v5 = vsel %vm566_vm2, %v3122_v4, 0.0  ;;  %v4318_v7 = vpop.f32.mrf.mxu1 }
 0xa3c   : > { %v3178_v8 = vadd.f32 %v3177_v5, %v3176_v3  ;;  %v4312_v10 = vpop.f32.mrf.mxu0 }
 0xa3d   : > { %v3171_v15 = vpop.f32.mrf.mxu1 }
 0xa3e   : > { %v3180_v17 = vadd.f32 %v3179_v13, %v3178_v8  ;;  %v3125_v18 = vpop.f32.mrf.mxu0  ;;  %v3329_v8 = vld [vmem:[%s4599_s21] sm:$0x7] }
 0xa3f   : > { %v4319_v19 = vpop.f32.mrf.mxu1  ;;  %v3333_v10 = vrot.slane %v3329_v8, %v4804_v14  ;;  %v3487_v28 = vrot.slane %v3329_v8, %v4823_v47 }
 0xa40   : > { %v3187_v20 = vadd.f32 %v3186_v9, %v3180_v17  ;;  %v4313_v21 = vpop.f32.mrf.mxu0 }
 0xa42   : > { %v3188_v12 = vadd.f32 %v3187_v20, %v4830_v54  ;;  %v4390_v54 = vld [vmem:[%s4579_s22] ss:$8 sps:$4 sm:$0xff]  }
 0xa43   : > { %3267 = vmatpush1.bf16.msra.mxu0 %v4390_v54  ;;  %v3492_v54 = vrot.slane %v3329_v8, %v4826_v48 }
 0xa44   : > { %v3189_v11 = vsel %vm566_vm2, %v3188_v12, 0.0 }
 0xa45   : > { %3190 = vadd.xlane.f32.xlu0 %v3189_v11 }
 0xace   : > { %v3191_v22 = vpop.xlane.xlu0 %3190 }
 0xacf   : > { %v3192_v23 = vmul.f32 0.03125, %v3191_v22 }
 0xad1   : > { %v3193_v24 = vsub.f32 %v3188_v12, %v3192_v23 }
 0xad3   : > { %v3194_v25 = vmul.f32 %v3193_v24, %v3193_v24 }
 0xad5   : > { %v3195_v27 = vsel %vm566_vm2, %v3194_v25, 0.0 }
 0xad6   : > { %3196 = vadd.xlane.f32.xlu1 %v3195_v27 }
 0xb5f   : > { %v3197_v43 = vpop.xlane.xlu1 %3196 }
 0xb60   : > { %v3198_v44 = vmul.f32 0.03125, %v3197_v43 }
 0xb62   : > { %v3199_v45 = vadd.f32 1e-05, %v3198_v44 }
 0xb64   : > { %4443 = vrsqrt.f32 %v3199_v45 }
 0xb71   : > { %v4444_v49 = vpop.eup %4443 }
 0xb72   : > { %v3201_v51 = vmul.f32 %v4444_v49, %v3193_v24 }
 0xb74   : > { %v3206_v52 = vmul.f32 %v3205_v46, %v3201_v51 }
 0xb76   : > { %v3211_v42 = vadd.f32 %v3210_v50, %v3206_v52 }
 0xb78   : > { %v3212_v53 = vpack.c.bf16 %v3211_v42, %v3211_v42 }
 0xb7a   : > { %3815 = vmatmul.mubr.msk.bf16.vlgmr.msra.gmra.mxu0 %vm566_vm2, %v3212_v53 }
 0xc3a   : > { %v3286_v60 = vpop.f32.mrf.mxu0 }
 0xc3b   : > { %v3287_v61 = vadd.f32 %v3286_v60, %v3222_v58 }
 0xc3c   : > { %v3288_v62 = vpop.f32.mrf.mxu0 }
 0xc3d   : > { %v3289_v63 = vadd.f32 %v3288_v62, %v3226_v59  ;;  %v3293_v0 = vmax.f32 %v3287_v61, 0.0 }
 0xc3e   : > { %v3290_v1 = vpop.f32.mrf.mxu0 }
 0xc3f   : > { %v3294_v3 = vmax.f32 %v3289_v63, 0.0  ;;  %v3295_v7 = vpack.c.bf16 %v3293_v0, %v3293_v0 }
 0xc40   : > { %v3291_v4 = vpop.f32.mrf.mxu0 }
 0xc41   : > { %v3296_v5 = vpack.c.bf16 %v3294_v3, %v3294_v3 }
 0xc43   : > { %3462 = vmatprep.mubr.bf16.mxu1 %v3296_v5 }
 0xc44   : > { %3463 = vmatmul.mubr.bf16.vlgmr.msra.gmra.mxu1 %v3295_v7 }
 0xd04   : > { %v3978_v9 = vpop.f32.mrf.mxu1 }
 0xd06   : > { %v3979_v13 = vpop.f32.mrf.mxu1 }
 0xd07   : > { %v3980_v15 = vadd.f32 %v3979_v13, %v3978_v9 }
 0xd08   : > { %v3981_v17 = vpop.f32.mrf.mxu1 }
 0xd09   : > { %v3465_v18 = vadd.f32 %v3980_v15, %v3333_v10 }
 0xd0a   : > { %v3982_v19 = vpop.f32.mrf.mxu1 }
 0xd0b   : > { %v3470_v20 = vadd.f32 %v3465_v18, %v3211_v42 }
 0xd0d   : > { %v3471_v21 = vsel %vm566_vm2, %v3470_v20, 0.0 }
 0xd0e   : > { %3472 = vadd.xlane.f32.xlu0 %v3471_v21 }
 0xd97   : > { %v3473_v12 = vpop.xlane.xlu0 %3472 }
 0xd98   : > { %v3474_v11 = vmul.f32 0.03125, %v3473_v12 }
 0xd9a   : > { %v3475_v22 = vsub.f32 %v3470_v20, %v3474_v11 }
 0xd9c   : > { %v3476_v23 = vmul.f32 %v3475_v22, %v3475_v22 }
 0xd9e   : > { %v3477_v24 = vsel %vm566_vm2, %v3476_v23, 0.0 }
 0xd9f   : > { %3478 = vadd.xlane.f32.xlu1 %v3477_v24 }
 0xe28   : > { %v3479_v25 = vpop.xlane.xlu1 %3478 }
 0xe29   : > { %v3480_v27 = vmul.f32 0.03125, %v3479_v25 }
 0xe2b   : > { %v3481_v14 = vadd.f32 1e-05, %v3480_v27 }
 0xe2d   : > { %4445 = vrsqrt.f32 %v3481_v14 }
 0xe3a   : > { %v4446_v29 = vpop.eup %4445 }
 0xe3b   : > { %v3483_v30 = vmul.f32 %v4446_v29, %v3475_v22 }
 0xe3d   : > { %v3488_v31 = vmul.f32 %v3487_v28, %v3483_v30 }
 0xe3f   : > { %v3493_v32 = vadd.f32 %v3492_v54, %v3488_v31 }
 0xe41   : > { %3494 = vst.msk [vmem:[#allocation2] sm:$0xff] %vm566_vm2, %v3493_v32 }
 0xe42   : > { %4460 = shalt.err (!%p4457_p13)
}
 0xe43   : > { %s5082_s29 = sld [smem:[#allocation8_spill]] }
 0xe49   : > { %4321 = dma.vmem_to_hbm [thread:$0]  (%p4324_p6), %s3503_s16, 128, %s5082_s29, [#allocation3]  }
 0xe4a   : > { %4476 = dma.done.wait (%p4324_p6), [#allocation3], 128  }
 0xe4b   : > { %4478 = vsyncadd (%p4324_p6), [#allocation3], 4294967168 }
 0xe4c PF: > { %s5083_s12 = sld [smem:[#allocation5_spill]] }
 0xe52   : > { %s21_s13 = sadd.s32 1, %s5083_s12  }
 0xe53   : > { %p18_p0 = scmp.ge.s32.totalorder %s21_s13, 4  }
 0xe55   :  { %20 = sbr.rel (!%p18_p0) target bundleno = 5 (0x5), region = 120 }
 0xe5a   :  { %3515 = vsyncpa [#allocation3], 1 }
 0xe5b   :  { %3517 = vsyncpa [#allocation3 + $0x1], 1 }

</bundles_post_ra>
